<compile_context>
chip_gen: v7x
topology: tpu7x:2x2x1
jax: 0.10.0
libtpu: 0.0.40
codegen_flags: <defaults>
</compile_context>

<pallas_src>
import functools

import jax
import jax.numpy as jnp
from jax.experimental import pallas as pl
from jax.experimental.pallas import tpu as pltpu


def _sab_kernel(xcm_ref, xseq_ref, wp_ref, bp_ref, wqp_ref, bqr_ref,
                wkp_ref, bkc_ref, wvp_ref, bvc_ref, gamma_ref, out_ref, *,
                block_b):
    # xcm_ref : (block_b, Cin, S) bf16   channel-major x (lane dim = S, dense)
    # xseq_ref: (block_b, S, Cin) bf16   tiny sequence-major x (q path only)
    # wp_ref  : (C, Cin) bf16, bp_ref: (C, 1) f32           input_proj
    # wqp_ref : (Cin, Cq) bf16, bqr_ref: (1, Cq) f32        folded (wq@wp)^T, bias
    # wkp_ref : (Cq, Cin) bf16, bkc_ref: (Cq, 1) f32        folded wk@wp, bias
    # wvp_ref : (C, Cin)  bf16, bvc_ref: (C, 1) f32         folded wv@wp, bias
    # gamma_ref: (1,) f32 in SMEM                           residual gate
    # out_ref : (block_b, C, S) f32                         lane-dense, NCHW-ready
    g = gamma_ref[0]                      # scalar read from SMEM
    wp = wp_ref[...]
    wqp = wqp_ref[...]
    wkp = wkp_ref[...]
    wvp = wvp_ref[...]
    bp = bp_ref[...]
    bqr = bqr_ref[...]
    bkc = bkc_ref[...]
    bvc = bvc_ref[...]

    for b in range(block_b):              # small static unroll (block_b <= 8)
        xcm = xcm_ref[b]                  # (Cin, S) bf16
        xseq = xseq_ref[b]                # (S, Cin) bf16

        # 1x1 convs == channel-major matmuls, lane dim = S.
        proj = jnp.dot(wp, xcm, preferred_element_type=jnp.float32) + bp    # (C, S)
        q = jnp.dot(xseq, wqp, preferred_element_type=jnp.float32) + bqr    # (S, Cq)
        k = jnp.dot(wkp, xcm, preferred_element_type=jnp.float32) + bkc     # (Cq, S)
        v = jnp.dot(wvp, xcm, preferred_element_type=jnp.float32) + bvc     # (C, S)

        # scores[i, j] = q_i . k_j   (this module applies no 1/sqrt(d) scale).
        s = jnp.dot(q.astype(jnp.bfloat16), k.astype(jnp.bfloat16),
                    preferred_element_type=jnp.float32)                     # (S, S)
        s = s - jnp.max(s, axis=-1, keepdims=True)
        e = jnp.exp(s)                                                      # f32 softmax
        p = e * pl.reciprocal(jnp.sum(e, axis=-1, keepdims=True), approx=True)

        # out[c, i] = sum_j v[c, j] * p[i, j]  ==  V @ P^T  (rhs-transposed MXU form)
        attn = jax.lax.dot_general(
            v.astype(jnp.bfloat16), p.astype(jnp.bfloat16),
            (((1,), (1,)), ((), ())), preferred_element_type=jnp.float32)   # (C, S)

        out_ref[b] = (proj + g * attn).astype(out_ref.dtype)


def _pick_block_b(batch, max_block=8):
    """Largest divisor of batch <= max_block, keeping >= 2 grid steps when batch >= 2
    (so the 'parallel' batch axis can feed both v7x TensorCores)."""
    cap = max(1, min(max_block, batch if batch < 2 else batch // 2))
    for bb in range(cap, 0, -1):
        if batch % bb == 0:
            return bb
    return 1


def self_attention_bridge_forward(x_nchw, params, *, block_b=None, interpret=False):
    """params = (wp, bp, wq, bq, wk, bk, wv, bv, gamma); 1x1 conv weights squeezed to
    2-D (out, in), biases as (out, 1) columns, gamma of shape (1,)."""
    wp, bp, wq, bq, wk, bk, wv, bv, gamma = params
    B, Cin, H, W = x_nchw.shape
    S = H * W
    C = wp.shape[0]
    Cq = wq.shape[0]
    if block_b is None:
        block_b = _pick_block_b(B)
    assert B % block_b == 0, (B, block_b)
    grid = (B // block_b,)

    # NCHW -> channel-major sequence is a free reshape; bf16 halves activation DMA.
    x_cm = x_nchw.reshape(B, Cin, S).astype(jnp.bfloat16)
    # Tiny sequence-major copy of x (feeds only the q projection).
    x_seq = jnp.transpose(x_cm, (0, 2, 1))

    # Fold input_proj into the q/k/v convs (exact algebra on tiny weights, done in
    # the wrapper); cast matmul operands to bf16, keep biases in f32.
    wqp_t = jnp.transpose(wq @ wp).astype(jnp.bfloat16)   # (Cin, Cq)
    bq_row = jnp.transpose(wq @ bp + bq)                  # (1, Cq)
    wkp = (wk @ wp).astype(jnp.bfloat16)                  # (Cq, Cin)
    bk_col = wk @ bp + bk                                 # (Cq, 1)
    wvp = (wv @ wp).astype(jnp.bfloat16)                  # (C, Cin)
    bv_col = wv @ bp + bv                                 # (C, 1)
    wp_bf = wp.astype(jnp.bfloat16)                       # (C, Cin)

    flops = 2 * B * (2 * C * Cin * S + 2 * S * Cin * Cq + S * S * Cq + S * S * C)
    bytes_accessed = ((x_cm.size + x_seq.size) * 2 + B * C * S * 4
                      + (wp_bf.size + wqp_t.size + wkp.size + wvp.size) * 2
                      + (bp.size + bq_row.size + bk_col.size + bv_col.size) * 4 + 4)
    cost = pl.CostEstimate(flops=flops, transcendentals=B * S * S,
                           bytes_accessed=bytes_accessed)

    kernel = functools.partial(_sab_kernel, block_b=block_b)
    # TODO(synk): add a flash-style query-tile grid axis (online softmax) before S
    # grows past ~1-2K so the materialized (S, S) scores stay inside v7x's VMEM.
    out_cm = pl.pallas_call(
        kernel,
        out_shape=jax.ShapeDtypeStruct((B, C, S), jnp.float32),
        grid=grid,
        in_specs=[
            pl.BlockSpec((block_b, Cin, S), lambda b: (b, 0, 0)),   # x channel-major
            pl.BlockSpec((block_b, S, Cin), lambda b: (b, 0, 0)),   # x sequence-major
            pl.BlockSpec((C, Cin), lambda b: (0, 0)),               # wp
            pl.BlockSpec((C, 1), lambda b: (0, 0)),                 # bp
            pl.BlockSpec((Cin, Cq), lambda b: (0, 0)),              # (wq @ wp)^T
            pl.BlockSpec((1, Cq), lambda b: (0, 0)),                # folded q bias
            pl.BlockSpec((Cq, Cin), lambda b: (0, 0)),              # wk @ wp
            pl.BlockSpec((Cq, 1), lambda b: (0, 0)),                # folded k bias
            pl.BlockSpec((C, Cin), lambda b: (0, 0)),               # wv @ wp
            pl.BlockSpec((C, 1), lambda b: (0, 0)),                 # folded v bias
            pl.BlockSpec(memory_space=pltpu.MemorySpace.SMEM),      # gamma (scalar)
        ],
        out_specs=pl.BlockSpec((block_b, C, S), lambda b: (b, 0, 0)),
        compiler_params=pltpu.CompilerParams(
            dimension_semantics=("parallel",),
            vmem_limit_bytes=32 * 1024 * 1024),
        cost_estimate=cost,
        interpret=interpret,
    )(x_cm, x_seq, wp_bf, bp, wqp_t, bq_row, wkp, bk_col, wvp, bv_col, gamma)

    # (B, C, S) -> NCHW is a free reshape (no transpose).
    return out_cm.reshape(B, C, H, W)


def reference_forward(x_nchw, params):
    """Pure-JAX f32 reference matching the PyTorch SelfAttentionBridge semantics."""
    wp, bp, wq, bq, wk, bk, wv, bv, gamma = params
    B, Cin, H, W = x_nchw.shape
    S = H * W
    xcm = x_nchw.reshape(B, Cin, S).astype(jnp.float32)
    proj = jnp.einsum('ck,bks->bcs', wp, xcm) + bp[None]       # input_proj (1x1 conv)
    q = jnp.einsum('dc,bcs->bds', wq, proj) + bq[None]         # (B, Cq, S)
    k = jnp.einsum('dc,bcs->bds', wk, proj) + bk[None]         # (B, Cq, S)
    v = jnp.einsum('dc,bcs->bds', wv, proj) + bv[None]         # (B, C, S)
    s = jnp.einsum('bdi,bdj->bij', q, k)                       # (B, S, S), no scaling
    p = jax.nn.softmax(s, axis=-1)
    out = jnp.einsum('bcj,bij->bci', v, p)                     # (B, C, S)
    y = gamma[0] * out + proj
    return y.reshape(B, -1, H, W)


if __name__ == "__main__":
    # Small shapes consistent with the module: in_channels=4, out_channels=32,
    # 16x16 spatial (S = 256), batch=2; query/key width = out_channels // 8 = 4.
    B, Cin, H, W = 2, 4, 16, 16
    C = 32
    Cq = C // 8

    key = jax.random.PRNGKey(0)
    ks = jax.random.split(key, 9)
    # 1x1 Conv2d weights squeezed to (out, in); biases stored as (out, 1) columns.
    wp = jax.random.normal(ks[0], (C, Cin), jnp.float32) * 0.1    # input_proj.weight
    bp = jax.random.normal(ks[1], (C, 1), jnp.float32) * 0.1      # input_proj.bias
    wq = jax.random.normal(ks[2], (Cq, C), jnp.float32) * 0.1     # query.weight
    bq = jax.random.normal(ks[3], (Cq, 1), jnp.float32) * 0.1     # query.bias
    wk = jax.random.normal(ks[4], (Cq, C), jnp.float32) * 0.1     # key.weight
    bk = jax.random.normal(ks[5], (Cq, 1), jnp.float32) * 0.1     # key.bias
    wv = jax.random.normal(ks[6], (C, C), jnp.float32) * 0.1      # value.weight
    bv = jax.random.normal(ks[7], (C, 1), jnp.float32) * 0.1      # value.bias
    gamma0 = jnp.zeros((1,), jnp.float32)                         # torch init: zeros
    x = jax.random.normal(ks[8], (B, Cin, H, W), jnp.float32)

    # gamma = 0 (PyTorch init): output reduces to the input projection.
    params = (wp, bp, wq, bq, wk, bk, wv, bv, gamma0)
    y = self_attention_bridge_forward(x, params)
    jax.block_until_ready(y)
    y_ref = reference_forward(x, params)
    assert y.shape == (B, C, H, W)
    assert jnp.allclose(y, y_ref, atol=2e-2, rtol=2e-2), "mismatch at gamma=0"

    # Non-zero gate exercises the attention path; block_b=2 exercises the
    # multi-batch-per-grid-step path (default for B=2 is block_b=1, grid=(2,)).
    params_g = (wp, bp, wq, bq, wk, bk, wv, bv, jnp.full((1,), 0.7, jnp.float32))
    y2 = self_attention_bridge_forward(x, params_g, block_b=2)
    jax.block_until_ready(y2)
    y2_ref = reference_forward(x, params_g)
    assert jnp.allclose(y2, y2_ref, atol=2e-2, rtol=2e-2), "mismatch at gamma=0.7"

    print("KERNEL_OK")
</pallas_src>

<mosaic_0001>
module attributes {stable_mosaic.version = 11 : i64} {
  func.func @_sab_kernel(%arg0: i32, %arg1: memref<1x4x256xbf16, #tpu.memory_space<vmem>>, %arg2: memref<1x256x4xbf16, #tpu.memory_space<vmem>>, %arg3: memref<32x4xbf16, #tpu.memory_space<vmem>>, %arg4: memref<32x1xf32, #tpu.memory_space<vmem>>, %arg5: memref<4x4xbf16, #tpu.memory_space<vmem>>, %arg6: memref<1x4xf32, #tpu.memory_space<vmem>>, %arg7: memref<4x4xbf16, #tpu.memory_space<vmem>>, %arg8: memref<4x1xf32, #tpu.memory_space<vmem>>, %arg9: memref<32x4xbf16, #tpu.memory_space<vmem>>, %arg10: memref<32x1xf32, #tpu.memory_space<vmem>>, %arg11: memref<1xf32, #tpu.memory_space<smem>>, %arg12: memref<1x32x256xf32, #tpu.memory_space<vmem>>) attributes {dimension_semantics = [#tpu.dimension_semantics<parallel>], iteration_bounds = array<i64: 2>, scalar_prefetch = 0 : i64, scratch_operands = 0 : i64, tpu.core_type = #tpu.core_type<tc>, window_params = [{transform_indices = @transform_0, window_bounds = array<i64: 1, 4, 256>}, {transform_indices = @transform_1, window_bounds = array<i64: 1, 256, 4>}, {pipeline_mode = #tpu.pipeline_mode<synchronous>, transform_indices = @transform_2, window_bounds = array<i64: 32, 4>}, {pipeline_mode = #tpu.pipeline_mode<synchronous>, transform_indices = @transform_3, window_bounds = array<i64: 32, 1>}, {pipeline_mode = #tpu.pipeline_mode<synchronous>, transform_indices = @transform_4, window_bounds = array<i64: 4, 4>}, {pipeline_mode = #tpu.pipeline_mode<synchronous>, transform_indices = @transform_5, window_bounds = array<i64: 1, 4>}, {pipeline_mode = #tpu.pipeline_mode<synchronous>, transform_indices = @transform_6, window_bounds = array<i64: 4, 4>}, {pipeline_mode = #tpu.pipeline_mode<synchronous>, transform_indices = @transform_7, window_bounds = array<i64: 4, 1>}, {pipeline_mode = #tpu.pipeline_mode<synchronous>, transform_indices = @transform_8, window_bounds = array<i64: 32, 4>}, {pipeline_mode = #tpu.pipeline_mode<synchronous>, transform_indices = @transform_9, window_bounds = array<i64: 32, 1>}, {transform_indices = @transform_10, window_bounds = array<i64: 1>}, {transform_indices = @transform_11, window_bounds = array<i64: 1, 32, 256>}]} {
    %c0 = arith.constant 0 : index
    %0 = memref.load %arg11[%c0] : memref<1xf32, #tpu.memory_space<smem>>
    %c0_0 = arith.constant 0 : index
    %c0_1 = arith.constant 0 : index
    %1 = vector.load %arg3[%c0_0, %c0_1] : memref<32x4xbf16, #tpu.memory_space<vmem>>, vector<32x4xbf16>
    %c0_2 = arith.constant 0 : index
    %c0_3 = arith.constant 0 : index
    %2 = vector.load %arg5[%c0_2, %c0_3] : memref<4x4xbf16, #tpu.memory_space<vmem>>, vector<4x4xbf16>
    %c0_4 = arith.constant 0 : index
    %c0_5 = arith.constant 0 : index
    %3 = vector.load %arg7[%c0_4, %c0_5] : memref<4x4xbf16, #tpu.memory_space<vmem>>, vector<4x4xbf16>
    %c0_6 = arith.constant 0 : index
    %c0_7 = arith.constant 0 : index
    %4 = vector.load %arg9[%c0_6, %c0_7] : memref<32x4xbf16, #tpu.memory_space<vmem>>, vector<32x4xbf16>
    %c0_8 = arith.constant 0 : index
    %c0_9 = arith.constant 0 : index
    %5 = vector.load %arg4[%c0_8, %c0_9] : memref<32x1xf32, #tpu.memory_space<vmem>>, vector<32x1xf32>
    %c0_10 = arith.constant 0 : index
    %c0_11 = arith.constant 0 : index
    %6 = vector.load %arg6[%c0_10, %c0_11] : memref<1x4xf32, #tpu.memory_space<vmem>>, vector<1x4xf32>
    %c0_12 = arith.constant 0 : index
    %c0_13 = arith.constant 0 : index
    %7 = vector.load %arg8[%c0_12, %c0_13] : memref<4x1xf32, #tpu.memory_space<vmem>>, vector<4x1xf32>
    %c0_14 = arith.constant 0 : index
    %c0_15 = arith.constant 0 : index
    %8 = vector.load %arg10[%c0_14, %c0_15] : memref<32x1xf32, #tpu.memory_space<vmem>>, vector<32x1xf32>
    %c0_16 = arith.constant 0 : index
    %c0_17 = arith.constant 0 : index
    %c0_18 = arith.constant 0 : index
    %9 = vector.load %arg1[%c0_16, %c0_17, %c0_18] : memref<1x4x256xbf16, #tpu.memory_space<vmem>>, vector<1x4x256xbf16>
    %10 = vector.shape_cast %9 : vector<1x4x256xbf16> to vector<4x256xbf16>
    %c0_19 = arith.constant 0 : index
    %c0_20 = arith.constant 0 : index
    %c0_21 = arith.constant 0 : index
    %11 = vector.load %arg2[%c0_19, %c0_20, %c0_21] : memref<1x256x4xbf16, #tpu.memory_space<vmem>>, vector<1x256x4xbf16>
    %12 = vector.shape_cast %11 : vector<1x256x4xbf16> to vector<256x4xbf16>
    %cst = arith.constant dense<0.000000e+00> : vector<32x256xf32>
    %13 = tpu.matmul %1, %10, %cst {dimension_numbers = #tpu.dot_dimension_numbers<[1], [0], [0], [1], [0, 0, 1, 1], [], []>} : vector<32x4xbf16>, vector<4x256xbf16>, vector<32x256xf32> -> vector<32x256xf32>
    %14 = vector.broadcast %5 : vector<32x1xf32> to vector<32x256xf32>
    %15 = arith.addf %13, %14 : vector<32x256xf32>
    %cst_22 = arith.constant dense<0.000000e+00> : vector<256x4xf32>
    %16 = tpu.matmul %12, %2, %cst_22 {dimension_numbers = #tpu.dot_dimension_numbers<[1], [0], [0], [1], [0, 0, 1, 1], [], []>} : vector<256x4xbf16>, vector<4x4xbf16>, vector<256x4xf32> -> vector<256x4xf32>
    %17 = vector.broadcast %6 : vector<1x4xf32> to vector<256x4xf32>
    %18 = arith.addf %16, %17 : vector<256x4xf32>
    %cst_23 = arith.constant dense<0.000000e+00> : vector<4x256xf32>
    %19 = tpu.matmul %3, %10, %cst_23 {dimension_numbers = #tpu.dot_dimension_numbers<[1], [0], [0], [1], [0, 0, 1, 1], [], []>} : vector<4x4xbf16>, vector<4x256xbf16>, vector<4x256xf32> -> vector<4x256xf32>
    %20 = vector.broadcast %7 : vector<4x1xf32> to vector<4x256xf32>
    %21 = arith.addf %19, %20 : vector<4x256xf32>
    %cst_24 = arith.constant dense<0.000000e+00> : vector<32x256xf32>
    %22 = tpu.matmul %4, %10, %cst_24 {dimension_numbers = #tpu.dot_dimension_numbers<[1], [0], [0], [1], [0, 0, 1, 1], [], []>} : vector<32x4xbf16>, vector<4x256xbf16>, vector<32x256xf32> -> vector<32x256xf32>
    %23 = vector.broadcast %8 : vector<32x1xf32> to vector<32x256xf32>
    %24 = arith.addf %22, %23 : vector<32x256xf32>
    %25 = arith.truncf %18 : vector<256x4xf32> to vector<256x4xbf16>
    %26 = arith.truncf %21 : vector<4x256xf32> to vector<4x256xbf16>
    %cst_25 = arith.constant dense<0.000000e+00> : vector<256x256xf32>
    %27 = tpu.matmul %25, %26, %cst_25 {dimension_numbers = #tpu.dot_dimension_numbers<[1], [0], [0], [1], [0, 0, 1, 1], [], []>} : vector<256x4xbf16>, vector<4x256xbf16>, vector<256x256xf32> -> vector<256x256xf32>
    %cst_26 = arith.constant dense<0xFF800000> : vector<256xf32>
    %28 = vector.multi_reduction <maximumf>, %27, %cst_26 [1] : vector<256x256xf32> to vector<256xf32>
    %29 = vector.shape_cast %28 : vector<256xf32> to vector<256x1xf32>
    %30 = vector.broadcast %29 : vector<256x1xf32> to vector<256x256xf32>
    %31 = arith.subf %27, %30 : vector<256x256xf32>
    %32 = math.exp %31 : vector<256x256xf32>
    %cst_27 = arith.constant dense<0.000000e+00> : vector<256xf32>
    %33 = vector.multi_reduction <add>, %32, %cst_27 [1] : vector<256x256xf32> to vector<256xf32>
    %34 = vector.shape_cast %33 : vector<256xf32> to vector<256x1xf32>
    %35 = tpu.reciprocal %34 {approx = true} : vector<256x1xf32> -> vector<256x1xf32>
    %36 = vector.broadcast %35 : vector<256x1xf32> to vector<256x256xf32>
    %37 = arith.mulf %32, %36 : vector<256x256xf32>
    %38 = arith.truncf %24 : vector<32x256xf32> to vector<32x256xbf16>
    %39 = arith.truncf %37 : vector<256x256xf32> to vector<256x256xbf16>
    %cst_28 = arith.constant dense<0.000000e+00> : vector<32x256xf32>
    %40 = tpu.matmul %38, %39, %cst_28 {dimension_numbers = #tpu.dot_dimension_numbers<[1], [1], [0], [0], [0, 0, 1, 0], [], []>} : vector<32x256xbf16>, vector<256x256xbf16>, vector<32x256xf32> -> vector<32x256xf32>
    %41 = vector.broadcast %0 : f32 to vector<32x256xf32>
    %42 = arith.mulf %41, %40 : vector<32x256xf32>
    %43 = arith.addf %15, %42 : vector<32x256xf32>
    %c0_29 = arith.constant 0 : index
    %c0_30 = arith.constant 0 : index
    %c0_31 = arith.constant 0 : index
    %44 = vector.load %arg12[%c0_29, %c0_30, %c0_31] : memref<1x32x256xf32, #tpu.memory_space<vmem>>, vector<1x32x256xf32>
    %45 = vector.shape_cast %44 : vector<1x32x256xf32> to vector<32x256xf32>
    %46 = vector.shape_cast %43 : vector<32x256xf32> to vector<1x32x256xf32>
    tpu.vector_store %arg12[%c0_29, %c0_30, %c0_31], %46 {strides = array<i32>} : memref<1x32x256xf32, #tpu.memory_space<vmem>>, vector<1x32x256xf32>,
    return
  }
  func.func @transform_0(%arg0: i32) -> (i32, i32, i32) {
    %c0_i32 = arith.constant 0 : i32
    %c0_i32_0 = arith.constant 0 : i32
    %c0_i32_1 = arith.constant 0 : i32
    return %arg0, %c0_i32, %c0_i32_0 : i32, i32, i32
  }
  func.func @transform_1(%arg0: i32) -> (i32, i32, i32) {
    %c0_i32 = arith.constant 0 : i32
    %c0_i32_0 = arith.constant 0 : i32
    %c0_i32_1 = arith.constant 0 : i32
    return %arg0, %c0_i32, %c0_i32_0 : i32, i32, i32
  }
  func.func @transform_2(%arg0: i32) -> (i32, i32) {
    %c0_i32 = arith.constant 0 : i32
    %c0_i32_0 = arith.constant 0 : i32
    %c0_i32_1 = arith.constant 0 : i32
    return %c0_i32, %c0_i32_0 : i32, i32
  }
  func.func @transform_3(%arg0: i32) -> (i32, i32) {
    %c0_i32 = arith.constant 0 : i32
    %c0_i32_0 = arith.constant 0 : i32
    %c0_i32_1 = arith.constant 0 : i32
    return %c0_i32, %c0_i32_0 : i32, i32
  }
  func.func @transform_4(%arg0: i32) -> (i32, i32) {
    %c0_i32 = arith.constant 0 : i32
    %c0_i32_0 = arith.constant 0 : i32
    %c0_i32_1 = arith.constant 0 : i32
    return %c0_i32, %c0_i32_0 : i32, i32
  }
  func.func @transform_5(%arg0: i32) -> (i32, i32) {
    %c0_i32 = arith.constant 0 : i32
    %c0_i32_0 = arith.constant 0 : i32
    %c0_i32_1 = arith.constant 0 : i32
    return %c0_i32, %c0_i32_0 : i32, i32
  }
  func.func @transform_6(%arg0: i32) -> (i32, i32) {
    %c0_i32 = arith.constant 0 : i32
    %c0_i32_0 = arith.constant 0 : i32
    %c0_i32_1 = arith.constant 0 : i32
    return %c0_i32, %c0_i32_0 : i32, i32
  }
  func.func @transform_7(%arg0: i32) -> (i32, i32) {
    %c0_i32 = arith.constant 0 : i32
    %c0_i32_0 = arith.constant 0 : i32
    %c0_i32_1 = arith.constant 0 : i32
    return %c0_i32, %c0_i32_0 : i32, i32
  }
  func.func @transform_8(%arg0: i32) -> (i32, i32) {
    %c0_i32 = arith.constant 0 : i32
    %c0_i32_0 = arith.constant 0 : i32
    %c0_i32_1 = arith.constant 0 : i32
    return %c0_i32, %c0_i32_0 : i32, i32
  }
  func.func @transform_9(%arg0: i32) -> (i32, i32) {
    %c0_i32 = arith.constant 0 : i32
    %c0_i32_0 = arith.constant 0 : i32
    %c0_i32_1 = arith.constant 0 : i32
    return %c0_i32, %c0_i32_0 : i32, i32
  }
  func.func @transform_10(%arg0: i32) -> i32 {
    %c0_i32 = arith.constant 0 : i32
    %c0_i32_0 = arith.constant 0 : i32
    return %c0_i32 : i32
  }
  func.func @transform_11(%arg0: i32) -> (i32, i32, i32) {
    %c0_i32 = arith.constant 0 : i32
    %c0_i32_0 = arith.constant 0 : i32
    %c0_i32_1 = arith.constant 0 : i32
    return %arg0, %c0_i32, %c0_i32_0 : i32, i32, i32
  }
}

</mosaic_0001>

<bundles_post_ra>
// kernel: tpu_custom_call.1
= control target key start
LH: loop header
LB: loop body
LE: loop exit
PB: predicated region body
PF: predicated region fallthrough
CT: control target
= control target key end

     0   :  { %s3343_s0 = inlined_call_operand.vmem [shape: bf16[2,4,256], index: 0, kind: input, shape index: {}]   ;;  %s3344_s1 = inlined_call_operand.vmem [shape: bf16[2,256,4], index: 1, kind: input, shape index: {}]   ;;  %s3345_s2 = inlined_call_operand.vmem [shape: bf16[32,4], index: 2, kind: input, shape index: {}]   ;;  %s3346_s3 = inlined_call_operand.vmem [shape: f32[32,1], index: 3, kind: input, shape index: {}]   ;;  %s3347_s4 = inlined_call_operand.vmem [shape: bf16[4,4], index: 4, kind: input, shape index: {}]   ;;  %s3348_s5 = inlined_call_operand.vmem [shape: f32[1,4], index: 5, kind: input, shape index: {}]   ;;  %s3349_s6 = inlined_call_operand.vmem [shape: bf16[4,4], index: 6, kind: input, shape index: {}]   ;;  %s3350_s7 = inlined_call_operand.vmem [shape: f32[4,1], index: 7, kind: input, shape index: {}]   ;;  %s3351_s8 = inlined_call_operand.vmem [shape: bf16[32,4], index: 8, kind: input, shape index: {}]   ;;  %s3352_s9 = inlined_call_operand.vmem [shape: f32[32,1], index: 9, kind: input, shape index: {}]   ;;  %s3353_s10 = inlined_call_operand.<no memory space> [shape: f32[1], index: 10, kind: input, shape index: {}]   ;;  %s3354_s11 = inlined_call_operand.hbm [shape: f32[2,32,256], index: 11, kind: output, shape index: {}]  }
   0x1   :  { %16 = sst [smem:[#allocation2]] %s3353_s10 }
   0x2   :  { %17 = vsyncpa [#allocation4], 0 }
   0x3   :  { %19 = vsyncpa [#allocation4 + $0x1], 0  ;;  %s2469_s19 = smov 0   ;;  %s2471_s20 = smov 0  }
   0x4   :  { %s2473_s21 = smov 0   ;;  %s2475_s22 = smov 0  }
   0x5 LB: > { %3383 = sst [smem:[#allocation6_spill]] %s2396_s21  ;;  %s2490_s10 = sadd.s32 4294967295, %s2400_s22   ;;  %s2400_s22 = sphi %s2475_s22, %s3484_s22   ;;  %s2396_s21 = sphi %s2473_s21, %s3481_s21   ;;  %s2392_s20 = sphi %s2471_s20, %s3483_s20   ;;  %s2388_s19 = sphi %s2469_s19, %s3482_s19  }
   0x6   : > { %s1950_s23 = sadd.s32 4294967294, %s2400_s22   ;;  %s2494_s24 = sadd.s32 1, %s2400_s22  }
   0x7   : > { %s273_s25 = sadd.s32 1, %s2396_s21  ;;  %s270_s26 = ssub.s32 %s2400_s22, %s2494_s24 }
   0x8   : > { %p283_p0 = scmp.ne.s32.totalorder %s2396_s21, %s2392_s20  ;;  %p271_p1 = scmp.eq.s32.totalorder %s270_s26, 0 }
   0x9   : > { %p284_p2 = scmp.eq.s32.totalorder %s2490_s10, 1  ;;  %p289_p3 = scmp.ne.s32.totalorder %s2392_s20, %s2388_s19 }
   0xa   : > { %p290_p4 = scmp.eq.s32.totalorder %s1950_s23, 1  ;;  %p1953_p7 = scmp.ge.s32.totalorder %s2400_s22, 1 }
   0xb   : > { %s2505_s27 = scalar_select %p271_p1, %s2396_s21, %s273_s25  }
   0xc   : > { %p2507_p5 = por %p284_p2, %p283_p0  ;;  %p2511_p6 = por %p290_p4, %p289_p3 }
   0xd   : > { %3384 = sst [smem:[#allocation7_spill]] %s2505_s27  ;;  %p351_p8 = scmp.lt.s32.totalorder %s2400_s22, 3 }
   0xf   : > { %p352_p9 = pnand %p1953_p7, %p351_p8 }
  0x11   : > { %355 = sbr.rel (%p352_p9) target bundleno = 1283 (0x503), region = 64 }
  0x18   : > { %p396_p10 = scmp.lt.s32.totalorder %s2490_s10, 1  ;;  %v2402_v0 = vmov 0   ;;  %vm507_vm0 = vcmask 1041408   ;;  %v423_v1 = vld [vmem:[%s3350_s7] sm:$0xf]  ;;  %vm500_vm1 = vcmask 31744  }
  0x19   : > { %546 = vmatprep.mubr.bf16.mxu1 %v2402_v0  ;;  %905 = vmatprep.mubr.bf16.mxu0 %v2402_v0  ;;  %v412_v5 = vld [vmem:[%s3347_s4] sm:$0x3]  ;;  %v2127_v9 = vld [vmem:[%s3345_s2 + $0x8] sm:$0xff]   ;;  %s407_s13 = sld [smem:[#allocation2]] }
  0x1a   : > { %s397_s30 = scalar_select %p396_p10, %s2490_s10, 1  ;;  %2124 = vset.pattern.permute.xlu0 %v2402_v0  ;;  %2125 = vset.pattern.permute.xlu1 %v2402_v0  ;;  %v2126_v6 = vld [vmem:[%s3345_s2] sm:$0xff]   ;;  %v702_v8 = vsel %vm507_vm0, %v412_v5, 0  ;;  %v2145_v27 = vld [vmem:[%s3351_s8 + $0x8] sm:$0xff]  }
  0x1b   : > { %867 = vperm.xlu0 %2124, %v423_v1   ;;  %v413_v7 = vld [vmem:[%s3349_s6] sm:$0x3] }
  0x1c   : > { %s2027_s14 = sshll.u32 %s397_s30, 2  ;;  %s2028_s15 = sshll.u32 %s397_s30, 7  ;;  %v2144_v26 = vld [vmem:[%s3351_s8] sm:$0xff]  }
  0x1d   : > { %s400_s18 = scalar_lea.vmem %s3343_s0, %s2027_s14  ;;  %s2532_s26 = scalar_lea.vmem %s3344_s1, %s2028_s15  ;;  %v2620_v47 = vld [vmem:[%s3348_s5] ss:$0 sm:$0xff] }
  0x1e   : > { %v1961_v2 = vld.sshfl [vmem:[%s400_s18] sm:$0x33 pattern:$0x76325410]  ;;  %v2129_v11 = vld [vmem:[%s2532_s26 + $0x8] sm:$0xff]   ;;  %v2130_v12 = vld [vmem:[%s2532_s26 + $0x10] sm:$0xff]  }
  0x1f   : > { %v499_v3 = vcombine.high %v1961_v2, %v1961_v2  ;;  %v509_v4 = vsel %vm507_vm0, %v1961_v2, 0  ;;  %v2128_v10 = vld [vmem:[%s2532_s26] sm:$0xff]   ;;  %v2131_v13 = vld [vmem:[%s2532_s26 + $0x18] sm:$0xff]   ;;  %v2133_v15 = vld [vmem:[%s2532_s26 + $0x28] sm:$0xff]   ;;  %s393_s14 = sand.u32 1, %s2392_s20   ;;  %s2029_s15 = sshll.u32 %s2490_s10, 10 }
  0x20   : > { %v2132_v14 = vld [vmem:[%s2532_s26 + $0x20] sm:$0xff]   ;;  %v2134_v16 = vld [vmem:[%s2532_s26 + $0x30] sm:$0xff]   ;;  %v2135_v17 = vld [vmem:[%s2532_s26 + $0x38] sm:$0xff]   ;;  %s1954_s21 = sshll.u32 %s393_s14, 6  ;;  %s3293_s23 = scalar_lea.hbm %s3354_s11, %s2029_s15 }
  0x21   : > { %1962 = vmatprep.subr.msk.bf16.mxu1 %vm507_vm0, %v499_v3  ;;  %1998 = vmatprep.subr.msk.bf16.mxu0 %vm507_vm0, %v499_v3  ;;  %v2136_v18 = vld [vmem:[%s2532_s26 + $0x40] sm:$0xff]   ;;  %v2137_v19 = vld [vmem:[%s2532_s26 + $0x48] sm:$0xff]   ;;  %v2138_v20 = vld [vmem:[%s2532_s26 + $0x50] sm:$0xff]   ;;  %s3277_s27 = scalar_lea.vmem [#allocation3], %s1954_s21  ;;  %s3302_s10 = scalar_lea.sflag [#allocation4], %s393_s14 }
  0x22   : > { %515 = vmatpush1.bf16.msra.mxu1 %v509_v4  ;;  %874 = vmatpush1.bf16.msra.mxu0 %v509_v4  ;;  %v2139_v21 = vld [vmem:[%s2532_s26 + $0x58] sm:$0xff]   ;;  %v2140_v22 = vld [vmem:[%s2532_s26 + $0x60] sm:$0xff]   ;;  %v2141_v23 = vld [vmem:[%s2532_s26 + $0x68] sm:$0xff]   ;;  %s1876_s16 = sshll.u32 %s3277_s27, 4  ;;  %s3295_s16 = int_to_ptr.vmem [resolvable:$true] %s1876_s16 }
  0x23   : > { %2081 = vmatprep.subr.msk.bf16.mxu1 %vm507_vm0, %v412_v5  ;;  %2002 = vmatprep.subr.msk.bf16.mxu0 %vm507_vm0, %v499_v3  ;;  %v2142_v24 = vld [vmem:[%s2532_s26 + $0x70] sm:$0xff]   ;;  %v2143_v25 = vld [vmem:[%s2532_s26 + $0x78] sm:$0xff]   ;;  %s2338_s25 = scalar_lea.vmem %s3295_s16, 1024  ;;  %s2403_s26 = smov [#allocation3]  }
  0x24   : > { %p2339_p11 = scmp.ne.s32.totalorder %s3295_s16, %s2338_s25  ;;  %s2342_s30 = sshll.u32 %s2403_s26, 4  ;;  %s2343_s30 = int_to_ptr.vmem [resolvable:$false] %s2342_s30 }
  0x25   : > { %1963 = vmatmul.mubr.msk.bf16.vlgmr.msra.gmra.mrb[0].mxu1 %vm500_vm1, %v2126_v6  ;;  %1999 = vmatmul.mubr.msk.bf16.vlgmr.msra.gmra.mrb[0].mxu0 %vm500_vm1, %v413_v7  ;;  %s2344_s12 = scalar_lea.vmem %s2343_s30, 2048  ;;  %p2345_p0 = scmp.lt.s32.totalorder %s3295_s16, %s2343_s30 }
  0x26   : > { %2048 = vmatpush3.bf16.msra.mxu1 %v702_v8  ;;  %556 = vmatprep.mubr.bf16.mxu1 %v2402_v0  ;;  %p2340_p12 = pnand %p2339_p11, %p2507_p5  ;;  %p2346_p1 = scmp.lt.s32.totalorder %s2344_s12, %s2338_s25 }
  0x27   : > { %951 = vmatpush1.bf16.msra.mxu0 %v509_v4  ;;  %982 = vmatprep.mubr.bf16.mxu0 %v2402_v0 }
  0x28   : > { %p2341_p13 = pneg %p2340_p12  ;;  %p2347_p2 = por %p2346_p1, %p2345_p0 }
  0x2a   : > { %p2348_p3 = pnand %p2347_p2, %p2341_p13 }
  0x2d   : > { %1964 = vmatmul.mubr.msk.bf16.gmra.mrb[4].mxu1 %vm500_vm1, %v2127_v9  ;;  %2003 = vmatmul.mubr.msk.bf16.vlgmr.msra.gmra.mrb[4].mxu0 %vm500_vm1, %v2144_v26 }
  0x2e   : > { %2049 = vmatprep.mubr.msk.bf16.mxu1 %vm500_vm1, %v2128_v10  ;;  %992 = vmatprep.mubr.bf16.mxu0 %v2402_v0 }
  0x35   : > { %2050 = vmatmul.mubr.msk.bf16.vlgmr.msra.gmra.mrb[8].mxu1 %vm500_vm1, %v2129_v11  ;;  %2004 = vmatmul.mubr.msk.bf16.gmra.mrb[8].mxu0 %vm500_vm1, %v2145_v27 }
  0x36   : > { %2053 = vmatprep.mubr.msk.bf16.mxu1 %vm500_vm1, %v2130_v12  ;;  %1107 = vmatprep.mubr.bf16.mxu0 %v2402_v0 }
  0x3d   : > { %2054 = vmatmul.mubr.msk.bf16.gmra.mrb[12].mxu1 %vm500_vm1, %v2131_v13 }
  0x3e   : > { %2057 = vmatprep.mubr.msk.bf16.mxu1 %vm500_vm1, %v2132_v14 }
  0x45   : > { %2058 = vmatmul.mubr.msk.bf16.gmra.mrb[16].mxu1 %vm500_vm1, %v2133_v15 }
  0x46   : > { %2061 = vmatprep.mubr.msk.bf16.mxu1 %vm500_vm1, %v2134_v16 }
  0x4d   : > { %2062 = vmatmul.mubr.msk.bf16.gmra.mrb[20].mxu1 %vm500_vm1, %v2135_v17 }
  0x4e   : > { %2065 = vmatprep.mubr.msk.bf16.mxu1 %vm500_vm1, %v2136_v18 }
  0x55   : > { %2066 = vmatmul.mubr.msk.bf16.gmra.mrb[24].mxu1 %vm500_vm1, %v2137_v19 }
  0x56   : > { %2069 = vmatprep.mubr.msk.bf16.mxu1 %vm500_vm1, %v2138_v20 }
  0x5d   : > { %2070 = vmatmul.mubr.msk.bf16.gmra.mrb[28].mxu1 %vm500_vm1, %v2139_v21 }
  0x5e   : > { %2073 = vmatprep.mubr.msk.bf16.mxu1 %vm500_vm1, %v2140_v22 }
  0x65   : > { %2074 = vmatmul.mubr.msk.bf16.gmra.mrb[32].mxu1 %vm500_vm1, %v2141_v23 }
  0x66   : > { %2077 = vmatprep.mubr.msk.bf16.mxu1 %vm500_vm1, %v2142_v24 }
  0x6d   : > { %2078 = vmatmul.mubr.msk.bf16.gmra.mrb[36].mxu1 %vm500_vm1, %v2143_v25 }
  0x9a   : > { %v868_v28 = vpop.permute.xlu0 %867 }
  0xf8   : > { %v2599_v29 = vpop.f32.mrb[0].mxu1  ;;  %v907_v30 = vpop.f32.mrb[0].mxu0 }
  0xf9   : > { %3387 = vst [vmem:[#allocation8_spill] sm:$0xff] %v2599_v29  ;;  %v2601_v31 = vpop.f32.mrb[1].mxu1  ;;  %v909_v32 = vpop.f32.mrb[1].mxu0  ;;  %v908_v33 = vadd.f32 %v907_v30, %v868_v28 }
  0xfa   : > { %3388 = vst [vmem:[#allocation9_spill] sm:$0xff] %v2601_v31  ;;  %v910_v34 = vadd.f32 %v909_v32, %v868_v28  ;;  %v2603_v35 = vpop.f32.mrb[2].mxu1  ;;  %v911_v36 = vpop.f32.mrb[2].mxu0 }
  0xfb   : > { %3389 = vst [vmem:[#allocation10_spill] sm:$0xff] %v2603_v35  ;;  %v1019_v37 = vpack.c.bf16 %v908_v33, %v908_v33  ;;  %v2605_v38 = vpop.f32.mrb[3].mxu1  ;;  %v912_v39 = vpop.f32.mrb[3].mxu0 }
  0xfc   : > { %3390 = vst [vmem:[#allocation11_spill] sm:$0xff] %v2605_v38  ;;  %v1020_v40 = vpack.c.bf16 %v910_v34, %v910_v34 }
  0xfd   : > { %v1070_v41 = vsel %vm507_vm0, %v1019_v37, 0 }
  0xfe   : > { %2005 = vmatprep.subr.msk.bf16.mxu0 %vm507_vm0, %v1020_v40 }
  0xff   : > { %1076 = vmatpush1.bf16.msra.mxu0 %v1070_v41 }
 0x100   : > { %v2609_v42 = vpop.f32.mrb[4].mxu1 }
 0x101   : > { %3391 = vst [vmem:[#allocation12_spill] sm:$0xff] %v2609_v42  ;;  %v2611_v43 = vpop.f32.mrb[5].mxu1 }
 0x102   : > { %3392 = vst [vmem:[#allocation13_spill] sm:$0xff] %v2611_v43  ;;  %v2613_v44 = vpop.f32.mrb[6].mxu1 }
 0x103   : > { %3393 = vst [vmem:[#allocation14_spill] sm:$0xff] %v2613_v44  ;;  %v2615_v45 = vpop.f32.mrb[7].mxu1 }
 0x104   : > { %3394 = vst [vmem:[#allocation15_spill] sm:$0xff] %v2615_v45 }
 0x108   : > { %v2051_v46 = vpop.f32.mrb[8].mxu1 }
 0x109   : > { %v738_v48 = vpop.f32.mrb[9].mxu1  ;;  %v747_v50 = vadd.f32 %v2051_v46, %v2620_v47 }
 0x10a   : > { %v2052_v49 = vpop.f32.mrb[10].mxu1  ;;  %v739_v53 = vadd.f32 %v2620_v47, %v738_v48 }
 0x10b   : > { %v750_v51 = vadd.f32 %v2052_v49, %v2620_v47  ;;  %v741_v52 = vpop.f32.mrb[11].mxu1 }
 0x10c   : > { %v742_v54 = vadd.f32 %v2620_v47, %v741_v52 }
 0x10d   : > { %v1004_v55 = vpack.c.bf16 %v750_v51, %v747_v50 }
 0x10e   : > { %v1003_v56 = vpack.c.bf16 %v742_v54, %v739_v53 }
 0x110   : > { %2006 = vmatmul.mubr.msk.bf16.vlgmr.msra.gmra.mrb[12].mxu0 %vm500_vm1, %v1003_v56  ;;  %v2055_v57 = vpop.f32.mrb[12].mxu1 }
 0x111   : > { %1117 = vmatprep.mubr.bf16.mxu0 %v2402_v0  ;;  %v763_v58 = vadd.f32 %v2055_v57, %v2620_v47  ;;  %v754_v59 = vpop.f32.mrb[13].mxu1 }
 0x112   : > { %v755_v60 = vadd.f32 %v2620_v47, %v754_v59  ;;  %v2056_v61 = vpop.f32.mrb[14].mxu1 }
 0x113   : > { %v766_v62 = vadd.f32 %v2056_v61, %v2620_v47  ;;  %v757_v63 = vpop.f32.mrb[15].mxu1 }
 0x114   : > { %v758_v1 = vadd.f32 %v2620_v47, %v757_v63 }
 0x115   : > { %v1006_v2 = vpack.c.bf16 %v766_v62, %v763_v58 }
 0x116   : > { %v1005_v3 = vpack.c.bf16 %v758_v1, %v755_v60 }
 0x118   : > { %2007 = vmatmul.mubr.msk.bf16.gmra.mrb[16].mxu0 %vm500_vm1, %v1004_v55  ;;  %v2059_v4 = vpop.f32.mrb[16].mxu1 }
 0x119   : > { %1127 = vmatprep.mubr.bf16.mxu0 %v2402_v0  ;;  %v779_v5 = vadd.f32 %v2059_v4, %v2620_v47  ;;  %v770_v6 = vpop.f32.mrb[17].mxu1 }
 0x11a   : > { %v771_v7 = vadd.f32 %v2620_v47, %v770_v6  ;;  %v2060_v8 = vpop.f32.mrb[18].mxu1 }
 0x11b   : > { %v782_v9 = vadd.f32 %v2060_v8, %v2620_v47  ;;  %v773_v10 = vpop.f32.mrb[19].mxu1 }
 0x11c   : > { %v774_v11 = vadd.f32 %v2620_v47, %v773_v10  ;;  %v2671_v10 = vpop.f32.mrb[4].mxu0 }
 0x11d   : > { %v1008_v12 = vpack.c.bf16 %v782_v9, %v779_v5  ;;  %3395 = vst [vmem:[#allocation16_spill] sm:$0xff] %v2671_v10 }
 0x11e   : > { %v1007_v13 = vpack.c.bf16 %v774_v11, %v771_v7  ;;  %v2674_v11 = vpop.f32.mrb[5].mxu0 }
 0x11f   : > { %3396 = vst [vmem:[#allocation17_spill] sm:$0xff] %v2674_v11 }
 0x120   : > { %2008 = vmatmul.mubr.msk.bf16.gmra.mrb[20].mxu0 %vm500_vm1, %v1005_v3  ;;  %v2063_v14 = vpop.f32.mrb[20].mxu1 }
 0x121   : > { %1137 = vmatprep.mubr.bf16.mxu0 %v2402_v0  ;;  %v795_v15 = vadd.f32 %v2063_v14, %v2620_v47  ;;  %v786_v16 = vpop.f32.mrb[21].mxu1 }
 0x122   : > { %v787_v17 = vadd.f32 %v2620_v47, %v786_v16  ;;  %v2064_v18 = vpop.f32.mrb[22].mxu1 }
 0x123   : > { %v798_v19 = vadd.f32 %v2064_v18, %v2620_v47  ;;  %v789_v20 = vpop.f32.mrb[23].mxu1 }
 0x124   : > { %v790_v21 = vadd.f32 %v2620_v47, %v789_v20 }
 0x125   : > { %v1010_v22 = vpack.c.bf16 %v798_v19, %v795_v15 }
 0x126   : > { %v1009_v23 = vpack.c.bf16 %v790_v21, %v787_v17 }
 0x128   : > { %2009 = vmatmul.mubr.msk.bf16.gmra.mrb[24].mxu0 %vm500_vm1, %v1006_v2  ;;  %v2067_v24 = vpop.f32.mrb[24].mxu1 }
 0x129   : > { %1147 = vmatprep.mubr.bf16.mxu0 %v2402_v0  ;;  %v811_v25 = vadd.f32 %v2067_v24, %v2620_v47  ;;  %v802_v26 = vpop.f32.mrb[25].mxu1 }
 0x12a   : > { %v803_v27 = vadd.f32 %v2620_v47, %v802_v26  ;;  %v2068_v28 = vpop.f32.mrb[26].mxu1 }
 0x12b   : > { %v814_v30 = vadd.f32 %v2068_v28, %v2620_v47  ;;  %v805_v32 = vpop.f32.mrb[27].mxu1 }
 0x12c   : > { %v806_v33 = vadd.f32 %v2620_v47, %v805_v32 }
 0x12d   : > { %v1012_v34 = vpack.c.bf16 %v814_v30, %v811_v25 }
 0x12e   : > { %v1011_v36 = vpack.c.bf16 %v806_v33, %v803_v27 }
 0x130   : > { %2010 = vmatmul.mubr.msk.bf16.gmra.mrb[28].mxu0 %vm500_vm1, %v1007_v13  ;;  %v2071_v37 = vpop.f32.mrb[28].mxu1 }
 0x131   : > { %1157 = vmatprep.mubr.bf16.mxu0 %v2402_v0  ;;  %v827_v39 = vadd.f32 %v2071_v37, %v2620_v47  ;;  %v818_v40 = vpop.f32.mrb[29].mxu1 }
 0x132   : > { %v819_v41 = vadd.f32 %v2620_v47, %v818_v40  ;;  %v2072_v46 = vpop.f32.mrb[30].mxu1 }
 0x133   : > { %v830_v48 = vadd.f32 %v2072_v46, %v2620_v47  ;;  %v821_v49 = vpop.f32.mrb[31].mxu1 }
 0x134   : > { %v822_v50 = vadd.f32 %v2620_v47, %v821_v49 }
 0x135   : > { %v1014_v51 = vpack.c.bf16 %v830_v48, %v827_v39 }
 0x136   : > { %v1013_v52 = vpack.c.bf16 %v822_v50, %v819_v41 }
 0x138   : > { %2011 = vmatmul.mubr.msk.bf16.gmra.mrb[32].mxu0 %vm500_vm1, %v1008_v12  ;;  %v2075_v53 = vpop.f32.mrb[32].mxu1  ;;  %v2676_v12 = vpop.f32.mrb[6].mxu0 }
 0x139   : > { %1167 = vmatprep.mubr.bf16.mxu0 %v2402_v0  ;;  %v843_v54 = vadd.f32 %v2075_v53, %v2620_v47  ;;  %v834_v55 = vpop.f32.mrb[33].mxu1  ;;  %3397 = vst [vmem:[#allocation18_spill] sm:$0xff] %v2676_v12  ;;  %v2678_v13 = vpop.f32.mrb[7].mxu0 }
 0x13a   : > { %v835_v56 = vadd.f32 %v2620_v47, %v834_v55  ;;  %v2076_v57 = vpop.f32.mrb[34].mxu1  ;;  %3398 = vst [vmem:[#allocation19_spill] sm:$0xff] %v2678_v13 }
 0x13b   : > { %v846_v58 = vadd.f32 %v2076_v57, %v2620_v47  ;;  %v837_v59 = vpop.f32.mrb[35].mxu1 }
 0x13c   : > { %v838_v60 = vadd.f32 %v2620_v47, %v837_v59 }
 0x13d   : > { %v1016_v61 = vpack.c.bf16 %v846_v58, %v843_v54 }
 0x13e   : > { %v1015_v62 = vpack.c.bf16 %v838_v60, %v835_v56 }
 0x140   : > { %2012 = vmatmul.mubr.msk.bf16.gmra.mrb[36].mxu0 %vm500_vm1, %v1009_v23  ;;  %v2079_v63 = vpop.f32.mrb[36].mxu1 }
 0x141   : > { %1177 = vmatprep.mubr.bf16.mxu0 %v2402_v0  ;;  %v859_v1 = vadd.f32 %v2079_v63, %v2620_v47  ;;  %v850_v2 = vpop.f32.mrb[37].mxu1 }
 0x142   : > { %v851_v3 = vadd.f32 %v2620_v47, %v850_v2  ;;  %v2080_v4 = vpop.f32.mrb[38].mxu1 }
 0x143   : > { %v862_v5 = vadd.f32 %v2080_v4, %v2620_v47  ;;  %v853_v6 = vpop.f32.mrb[39].mxu1 }
 0x144   : > { %v854_v7 = vadd.f32 %v2620_v47, %v853_v6  ;;  %v2681_v47 = vpop.f32.mrb[8].mxu0 }
 0x145   : > { %v1018_v8 = vpack.c.bf16 %v862_v5, %v859_v1  ;;  %3399 = vst [vmem:[#allocation20_spill] sm:$0xff] %v2681_v47  ;;  %v2684_v14 = vpop.f32.mrb[9].mxu0 }
 0x146   : > { %v1017_v9 = vpack.c.bf16 %v854_v7, %v851_v3  ;;  %3400 = vst [vmem:[#allocation21_spill] sm:$0xff] %v2684_v14  ;;  %v2686_v15 = vpop.f32.mrb[10].mxu0 }
 0x147   : > { %3401 = vst [vmem:[#allocation22_spill] sm:$0xff] %v2686_v15  ;;  %v2688_v16 = vpop.f32.mrb[11].mxu0 }
 0x148   : > { %2013 = vmatmul.mubr.msk.bf16.gmra.mrb[40].mxu0 %vm500_vm1, %v1010_v22  ;;  %3402 = vst [vmem:[#allocation23_spill] sm:$0xff] %v2688_v16 }
 0x149   : > { %1187 = vmatprep.mubr.bf16.mxu0 %v2402_v0 }
 0x150   : > { %2014 = vmatmul.mubr.msk.bf16.gmra.mrb[44].mxu0 %vm500_vm1, %v1011_v36 }
 0x151   : > { %1197 = vmatprep.mubr.bf16.mxu0 %v2402_v0 }
 0x158   : > { %2015 = vmatmul.mubr.msk.bf16.gmra.mrb[48].mxu0 %vm500_vm1, %v1012_v34 }
 0x159   : > { %1207 = vmatprep.mubr.bf16.mxu0 %v2402_v0 }
 0x160   : > { %2016 = vmatmul.mubr.msk.bf16.gmra.mrb[52].mxu0 %vm500_vm1, %v1013_v52 }
 0x161   : > { %1217 = vmatprep.mubr.bf16.mxu0 %v2402_v0 }
 0x168   : > { %2017 = vmatmul.mubr.msk.bf16.gmra.mrb[56].mxu0 %vm500_vm1, %v1014_v51 }
 0x169   : > { %1227 = vmatprep.mubr.bf16.mxu0 %v2402_v0 }
 0x170   : > { %2018 = vmatmul.mubr.msk.bf16.gmra.mrb[60].mxu0 %vm500_vm1, %v1015_v62 }
 0x171   : > { %1237 = vmatprep.mubr.bf16.mxu0 %v2402_v0 }
 0x178   : > { %2019 = vmatmul.mubr.msk.bf16.gmra.mrb[64].mxu0 %vm500_vm1, %v1016_v61 }
 0x179   : > { %1247 = vmatprep.mubr.bf16.mxu0 %v2402_v0 }
 0x180   : > { %2020 = vmatmul.mubr.msk.bf16.gmra.mrb[68].mxu0 %vm500_vm1, %v1017_v9 }
 0x181   : > { %1257 = vmatprep.mubr.bf16.mxu0 %v2402_v0 }
 0x188   : > { %2021 = vmatmul.mubr.msk.bf16.gmra.mrb[72].mxu0 %vm500_vm1, %v1018_v8 }
 0x1e3   : > { %v2701_v17 = vpop.f32.mrb[12].mxu0 }
 0x1e4   : > { %v2703_v18 = vpop.f32.mrb[13].mxu0 }
 0x1e5   : > { %v2705_v19 = vpop.f32.mrb[14].mxu0  ;;  %v1268_v20 = vmax.f32 %v2701_v17, %v2703_v18 }
 0x1e6   : > { %v2709_v21 = vpop.f32.mrb[15].mxu0 }
 0x1e7   : > { %1269 = vmax.xlane.f32.xlu0 %v1268_v20  ;;  %v1271_v22 = vmax.f32 %v2705_v19, %v2709_v21 }
 0x1e9   : > { %1272 = vmax.xlane.f32.xlu1 %v1271_v22 }
 0x1eb   : > { %v2713_v23 = vpop.f32.mrb[16].mxu0 }
 0x1ec   : > { %v2715_v0 = vpop.f32.mrb[17].mxu0 }
 0x1ed   : > { %v2717_v24 = vpop.f32.mrb[18].mxu0  ;;  %v1274_v25 = vmax.f32 %v2713_v23, %v2715_v0 }
 0x1ee   : > { %v2721_v26 = vpop.f32.mrb[19].mxu0 }
 0x1ef   : > { %1275 = vmax.xlane.f32.xlu1 %v1274_v25  ;;  %v1277_v27 = vmax.f32 %v2717_v24, %v2721_v26 }
 0x1f3   : > { %1278 = vmax.xlane.f32.xlu1 %v1277_v27  ;;  %v2725_v28 = vpop.f32.mrb[20].mxu0 }
 0x1f4   : > { %v2727_v30 = vpop.f32.mrb[21].mxu0 }
 0x1f5   : > { %v1280_v32 = vmax.f32 %v2725_v28, %v2727_v30  ;;  %v2731_v33 = vpop.f32.mrb[22].mxu0 }
 0x1f6   : > { %v2733_v34 = vpop.f32.mrb[23].mxu0 }
 0x1f7   : > { %1281 = vmax.xlane.f32.xlu1 %v1280_v32  ;;  %v1283_v36 = vmax.f32 %v2731_v33, %v2733_v34 }
 0x1fb   : > { %1284 = vmax.xlane.f32.xlu1 %v1283_v36  ;;  %v2737_v37 = vpop.f32.mrb[24].mxu0 }
 0x1fc   : > { %v2739_v39 = vpop.f32.mrb[25].mxu0 }
 0x1fd   : > { %v1286_v40 = vmax.f32 %v2737_v37, %v2739_v39  ;;  %v2743_v41 = vpop.f32.mrb[26].mxu0 }
 0x1fe   : > { %v2745_v46 = vpop.f32.mrb[27].mxu0 }
 0x1ff   : > { %1287 = vmax.xlane.f32.xlu1 %v1286_v40  ;;  %v1289_v48 = vmax.f32 %v2743_v41, %v2745_v46 }
 0x203   : > { %1290 = vmax.xlane.f32.xlu1 %v1289_v48  ;;  %v2749_v49 = vpop.f32.mrb[28].mxu0 }
 0x204   : > { %v2751_v50 = vpop.f32.mrb[29].mxu0 }
 0x205   : > { %v1292_v51 = vmax.f32 %v2749_v49, %v2751_v50  ;;  %v2755_v52 = vpop.f32.mrb[30].mxu0 }
 0x206   : > { %v2757_v53 = vpop.f32.mrb[31].mxu0 }
 0x207   : > { %1293 = vmax.xlane.f32.xlu1 %v1292_v51  ;;  %v1295_v54 = vmax.f32 %v2755_v52, %v2757_v53 }
 0x20b   : > { %1296 = vmax.xlane.f32.xlu1 %v1295_v54  ;;  %v2761_v55 = vpop.f32.mrb[32].mxu0 }
 0x20c   : > { %v2763_v56 = vpop.f32.mrb[33].mxu0 }
 0x20d   : > { %v2765_v57 = vpop.f32.mrb[34].mxu0  ;;  %v1298_v58 = vmax.f32 %v2761_v55, %v2763_v56 }
 0x20e   : > { %v2769_v59 = vpop.f32.mrb[35].mxu0 }
 0x20f   : > { %1299 = vmax.xlane.f32.xlu0 %v1298_v58  ;;  %v1301_v60 = vmax.f32 %v2765_v57, %v2769_v59 }
 0x211   : > { %1302 = vmax.xlane.f32.xlu1 %v1301_v60 }
 0x213   : > { %v2773_v61 = vpop.f32.mrb[36].mxu0 }
 0x214   : > { %v2775_v62 = vpop.f32.mrb[37].mxu0 }
 0x215   : > { %v2777_v63 = vpop.f32.mrb[38].mxu0  ;;  %v1304_v1 = vmax.f32 %v2773_v61, %v2775_v62 }
 0x216   : > { %v2781_v2 = vpop.f32.mrb[39].mxu0 }
 0x217   : > { %1305 = vmax.xlane.f32.xlu0 %v1304_v1  ;;  %v1307_v3 = vmax.f32 %v2777_v63, %v2781_v2 }
 0x219   : > { %1308 = vmax.xlane.f32.xlu1 %v1307_v3 }
 0x21b   : > { %v2785_v4 = vpop.f32.mrb[40].mxu0 }
 0x21c   : > { %v2787_v5 = vpop.f32.mrb[41].mxu0 }
 0x21d   : > { %v2789_v6 = vpop.f32.mrb[42].mxu0  ;;  %v1310_v7 = vmax.f32 %v2785_v4, %v2787_v5 }
 0x21e   : > { %v2793_v8 = vpop.f32.mrb[43].mxu0 }
 0x21f   : > { %1311 = vmax.xlane.f32.xlu0 %v1310_v7  ;;  %v1313_v9 = vmax.f32 %v2789_v6, %v2793_v8 }
 0x221   : > { %1314 = vmax.xlane.f32.xlu1 %v1313_v9 }
 0x223   : > { %v2797_v20 = vpop.f32.mrb[44].mxu0 }
 0x224   : > { %v2799_v22 = vpop.f32.mrb[45].mxu0 }
 0x225   : > { %v2801_v25 = vpop.f32.mrb[46].mxu0  ;;  %v1316_v27 = vmax.f32 %v2797_v20, %v2799_v22 }
 0x226   : > { %v2805_v32 = vpop.f32.mrb[47].mxu0 }
 0x227   : > { %1317 = vmax.xlane.f32.xlu0 %v1316_v27  ;;  %v1319_v36 = vmax.f32 %v2801_v25, %v2805_v32 }
 0x229   : > { %1320 = vmax.xlane.f32.xlu1 %v1319_v36 }
 0x22b   : > { %v2809_v40 = vpop.f32.mrb[48].mxu0 }
 0x22c   : > { %v2811_v48 = vpop.f32.mrb[49].mxu0 }
 0x22d   : > { %3403 = vst [vmem:[#allocation24_spill] sm:$0xff] %v2811_v48  ;;  %v2813_v51 = vpop.f32.mrb[50].mxu0  ;;  %v1322_v54 = vmax.f32 %v2809_v40, %v2811_v48 }
 0x22e   : > { %3404 = vst [vmem:[#allocation25_spill] sm:$0xff] %v2813_v51  ;;  %v2817_v58 = vpop.f32.mrb[51].mxu0 }
 0x22f   : > { %3405 = vst [vmem:[#allocation26_spill] sm:$0xff] %v2817_v58  ;;  %1323 = vmax.xlane.f32.xlu0 %v1322_v54  ;;  %v1325_v60 = vmax.f32 %v2813_v51, %v2817_v58 }
 0x231   : > { %1326 = vmax.xlane.f32.xlu1 %v1325_v60 }
 0x233   : > { %v2821_v1 = vpop.f32.mrb[52].mxu0 }
 0x234   : > { %3406 = vst [vmem:[#allocation27_spill] sm:$0xff] %v2821_v1  ;;  %v2823_v3 = vpop.f32.mrb[53].mxu0 }
 0x235   : > { %3407 = vst [vmem:[#allocation28_spill] sm:$0xff] %v2823_v3  ;;  %v2825_v7 = vpop.f32.mrb[54].mxu0  ;;  %v1328_v9 = vmax.f32 %v2821_v1, %v2823_v3 }
 0x236   : > { %3408 = vst [vmem:[#allocation29_spill] sm:$0xff] %v2825_v7  ;;  %v2829_v27 = vpop.f32.mrb[55].mxu0 }
 0x237   : > { %3409 = vst [vmem:[#allocation30_spill] sm:$0xff] %v2829_v27  ;;  %1329 = vmax.xlane.f32.xlu0 %v1328_v9  ;;  %v1331_v36 = vmax.f32 %v2825_v7, %v2829_v27 }
 0x239   : > { %1332 = vmax.xlane.f32.xlu1 %v1331_v36 }
 0x23b   : > { %v2833_v54 = vpop.f32.mrb[56].mxu0 }
 0x23c   : > { %3410 = vst [vmem:[#allocation31_spill] sm:$0xff] %v2833_v54  ;;  %v2835_v45 = vpop.f32.mrb[57].mxu0 }
 0x23d   : > { %3411 = vst [vmem:[#allocation32_spill] sm:$0xff] %v2835_v45  ;;  %v2837_v60 = vpop.f32.mrb[58].mxu0  ;;  %v1334_v44 = vmax.f32 %v2833_v54, %v2835_v45 }
 0x23e   : > { %3412 = vst [vmem:[#allocation33_spill] sm:$0xff] %v2837_v60  ;;  %v2841_v43 = vpop.f32.mrb[59].mxu0 }
 0x23f   : > { %3413 = vst [vmem:[#allocation34_spill] sm:$0xff] %v2841_v43  ;;  %1335 = vmax.xlane.f32.xlu0 %v1334_v44  ;;  %v1337_v42 = vmax.f32 %v2837_v60, %v2841_v43 }
 0x241   : > { %1338 = vmax.xlane.f32.xlu1 %v1337_v42 }
 0x243   : > { %v2845_v9 = vpop.f32.mrb[60].mxu0 }
 0x244   : > { %v2847_v38 = vpop.f32.mrb[61].mxu0 }
 0x245   : > { %v2849_v36 = vpop.f32.mrb[62].mxu0 }
 0x246   : > { %3414 = vst [vmem:[#allocation35_spill] sm:$0xff] %v2849_v36  ;;  %v2853_v31 = vpop.f32.mrb[63].mxu0 }
 0x247   : > { %3415 = vst [vmem:[#allocation36_spill] sm:$0xff] %v2853_v31  ;;  %v1343_v29 = vmax.f32 %v2849_v36, %v2853_v31 }
 0x249   : > { %1344 = vmax.xlane.f32.xlu1 %v1343_v29 }
 0x24b   : > { %v2857_v44 = vpop.f32.mrb[64].mxu0 }
 0x24c   : > { %v2859_v14 = vpop.f32.mrb[65].mxu0 }
 0x24d   : > { %v2861_v42 = vpop.f32.mrb[66].mxu0 }
 0x24e   : > { %v2865_v16 = vpop.f32.mrb[67].mxu0 }
 0x253   : > { %v2869_v15 = vpop.f32.mrb[68].mxu0 }
 0x254   : > { %v2871_v11 = vpop.f32.mrb[69].mxu0 }
 0x255   : > { %v2873_v10 = vpop.f32.mrb[70].mxu0 }
 0x256   : > { %v2877_v13 = vpop.f32.mrb[71].mxu0 }
 0x25b   : > { %v2881_v47 = vpop.f32.mrb[72].mxu0 }
 0x25c   : > { %v2883_v31 = vpop.f32.mrb[73].mxu0 }
 0x25d   : > { %v2885_v36 = vpop.f32.mrb[74].mxu0 }
 0x25e   : > { %v2889_v43 = vpop.f32.mrb[75].mxu0 }
 0x274   : > { %v1270_v29 = vpop.xlane.xlu0 %1269 }
 0x275   : > { %v1364_v45 = vsub.f32 %v2701_v17, %v1270_v29  ;;  %v1365_v54 = vsub.f32 %v2703_v18, %v1270_v29 }
 0x276   : > { %v1273_v12 = vpop.xlane.xlu1 %1272 }
 0x277   : > { %v1428_v27 = vmul.f32 1.442695, %v1364_v45  ;;  %v1430_v7 = vmul.f32 1.442695, %v1365_v54  ;;  %v1366_v3 = vsub.f32 %v2705_v19, %v1273_v12  ;;  %v1367_v1 = vsub.f32 %v2709_v21, %v1273_v12 }
 0x279   : > { %2146 = vpow2.f32 %v1428_v27  ;;  %v1432_v58 = vmul.f32 1.442695, %v1366_v3  ;;  %v1434_v35 = vmul.f32 1.442695, %v1367_v1 }
 0x27a   : > { %2148 = vpow2.f32 %v1430_v7 }
 0x27b   : > { %2150 = vpow2.f32 %v1432_v58 }
 0x27c   : > { %2152 = vpow2.f32 %v1434_v35  ;;  %v1276_v51 = vpop.xlane.xlu1 %1275 }
 0x27d   : > { %v1368_v60 = vsub.f32 %v2713_v23, %v1276_v51  ;;  %v1369_v17 = vsub.f32 %v2715_v0, %v1276_v51 }
 0x27f   : > { %v1436_v48 = vmul.f32 1.442695, %v1368_v60  ;;  %v1438_v18 = vmul.f32 1.442695, %v1369_v17 }
 0x280   : > { %v1279_v29 = vpop.xlane.xlu1 %1278 }
 0x281   : > { %2154 = vpow2.f32 %v1436_v48  ;;  %v1370_v45 = vsub.f32 %v2717_v24, %v1279_v29  ;;  %v1371_v19 = vsub.f32 %v2721_v26, %v1279_v29 }
 0x282   : > { %2156 = vpow2.f32 %v1438_v18  ;;  %v3416_v18 = vmax.f32 %v2845_v9, %v2847_v38 }
 0x283   : > { %v2901_v12 = vpop.eup %2146  ;;  %v1440_v21 = vmul.f32 1.442695, %v1370_v45  ;;  %v1442_v1 = vmul.f32 1.442695, %v1371_v19 }
 0x284   : > { %v2903_v58 = vpop.eup %2148  ;;  %v1282_v35 = vpop.xlane.xlu1 %1281 }
 0x285   : > { %v2905_v3 = vpop.eup %2150  ;;  %2158 = vpow2.f32 %v1440_v21  ;;  %v1372_v23 = vsub.f32 %v2725_v28, %v1282_v35  ;;  %v1373_v0 = vsub.f32 %v2727_v30, %v1282_v35  ;;  %v1556_v24 = vadd.f32 %v2903_v58, %v2901_v12 }
 0x286   : > { %v2911_v48 = vpop.eup %2152  ;;  %2160 = vpow2.f32 %v1442_v1 }
 0x287   : > { %v1444_v26 = vmul.f32 1.442695, %v1372_v23  ;;  %v1446_v51 = vmul.f32 1.442695, %v1373_v0  ;;  %1557 = vadd.xlane.f32.xlu0 %v1556_v24  ;;  %v1559_v7 = vadd.f32 %v2911_v48, %v2905_v3 }
 0x288   : > { %v1285_v27 = vpop.xlane.xlu1 %1284 }
 0x289   : > { %2162 = vpow2.f32 %v1444_v26  ;;  %v1374_v54 = vsub.f32 %v2731_v33, %v1285_v27  ;;  %v1375_v28 = vsub.f32 %v2733_v34, %v1285_v27  ;;  %1560 = vadd.xlane.f32.xlu1 %v1559_v7  ;;  %v3417_v34 = vmax.f32 %v2861_v42, %v2865_v16 }
 0x28a   : > { %2164 = vpow2.f32 %v1446_v51 }
 0x28b   : > { %v2917_v30 = vpop.eup %2154  ;;  %v1448_v60 = vmul.f32 1.442695, %v1374_v54  ;;  %v1450_v17 = vmul.f32 1.442695, %v1375_v28  ;;  %1341 = vmax.xlane.f32.xlu0 %v3416_v18  ;;  %v3418_v54 = vmax.f32 %v2857_v44, %v2859_v14 }
 0x28c   : > { %v2922_v29 = vpop.eup %2156  ;;  %v1288_v45 = vpop.xlane.xlu1 %1287 }
 0x28d   : > { %2166 = vpow2.f32 %v1448_v60  ;;  %v1376_v19 = vsub.f32 %v2737_v37, %v1288_v45  ;;  %v1377_v33 = vsub.f32 %v2739_v39, %v1288_v45  ;;  %1350 = vmax.xlane.f32.xlu1 %v3417_v34  ;;  %v1562_v21 = vadd.f32 %v2922_v29, %v2917_v30 }
 0x28e   : > { %2168 = vpow2.f32 %v1450_v17 }
 0x28f   : > { %v2931_v1 = vpop.eup %2158  ;;  %v1452_v35 = vmul.f32 1.442695, %v1376_v19  ;;  %v1454_v23 = vmul.f32 1.442695, %v1377_v33  ;;  %1563 = vadd.xlane.f32.xlu0 %v1562_v21  ;;  %v3419_v33 = vmax.f32 %v2873_v10, %v2877_v13 }
 0x290   : > { %v2933_v0 = vpop.eup %2160  ;;  %v1291_v24 = vpop.xlane.xlu1 %1290 }
 0x291   : > { %2170 = vpow2.f32 %v1452_v35  ;;  %v1378_v37 = vsub.f32 %v2743_v41, %v1291_v24  ;;  %v1379_v39 = vsub.f32 %v2745_v46, %v1291_v24  ;;  %v1565_v26 = vadd.f32 %v2933_v0, %v2931_v1 }
 0x292   : > { %2172 = vpow2.f32 %v1454_v23 }
 0x293   : > { %v2939_v51 = vpop.eup %2162  ;;  %v1456_v7 = vmul.f32 1.442695, %v1378_v37  ;;  %v1458_v27 = vmul.f32 1.442695, %v1379_v39  ;;  %1347 = vmax.xlane.f32.xlu0 %v3418_v54  ;;  %1566 = vadd.xlane.f32.xlu1 %v1565_v26  ;;  %v3420_v39 = vmax.f32 %v2869_v15, %v2871_v11 }
 0x294   : > { %v2944_v28 = vpop.eup %2164  ;;  %v1294_v60 = vpop.xlane.xlu1 %1293 }
 0x295   : > { %2174 = vpow2.f32 %v1456_v7  ;;  %v1380_v41 = vsub.f32 %v2749_v49, %v1294_v60  ;;  %v1381_v46 = vsub.f32 %v2751_v50, %v1294_v60  ;;  %v1568_v17 = vadd.f32 %v2944_v28, %v2939_v51 }
 0x296   : > { %2176 = vpow2.f32 %v1458_v27 }
 0x297   : > { %v2950_v18 = vpop.eup %2166  ;;  %v1460_v45 = vmul.f32 1.442695, %v1380_v41  ;;  %v1462_v19 = vmul.f32 1.442695, %v1381_v46  ;;  %1569 = vadd.xlane.f32.xlu0 %v1568_v17  ;;  %1356 = vmax.xlane.f32.xlu1 %v3419_v33 }
 0x298   : > { %v2955_v34 = vpop.eup %2168  ;;  %v1297_v21 = vpop.xlane.xlu1 %1296 }
 0x299   : > { %2178 = vpow2.f32 %v1460_v45  ;;  %v1382_v49 = vsub.f32 %v2755_v52, %v1297_v21  ;;  %v1383_v50 = vsub.f32 %v2757_v53, %v1297_v21  ;;  %v1571_v35 = vadd.f32 %v2955_v34, %v2950_v18 }
 0x29a   : > { %2180 = vpow2.f32 %v1462_v19  ;;  %v3421_v19 = vmax.f32 %v2885_v36, %v2889_v43 }
 0x29b   : > { %v2961_v23 = vpop.eup %2170  ;;  %v1464_v24 = vmul.f32 1.442695, %v1382_v49  ;;  %v1466_v37 = vmul.f32 1.442695, %v1383_v50  ;;  %1353 = vmax.xlane.f32.xlu0 %v3420_v39  ;;  %1572 = vadd.xlane.f32.xlu1 %v1571_v35 }
 0x29c   : > { %v2966_v26 = vpop.eup %2172  ;;  %v1300_v7 = vpop.xlane.xlu0 %1299 }
 0x29d   : > { %2182 = vpow2.f32 %v1464_v24  ;;  %v1384_v52 = vsub.f32 %v2761_v55, %v1300_v7  ;;  %v1385_v53 = vsub.f32 %v2763_v56, %v1300_v7  ;;  %v1574_v27 = vadd.f32 %v2966_v26, %v2961_v23 }
 0x29e   : > { %2184 = vpow2.f32 %v1466_v37  ;;  %v1303_v54 = vpop.xlane.xlu1 %1302 }
 0x29f   : > { %v2972_v60 = vpop.eup %2174  ;;  %v1468_v41 = vmul.f32 1.442695, %v1384_v52  ;;  %v1470_v46 = vmul.f32 1.442695, %v1385_v53  ;;  %v1386_v17 = vsub.f32 %v2765_v57, %v1303_v54  ;;  %v1387_v45 = vsub.f32 %v2769_v59, %v1303_v54  ;;  %1575 = vadd.xlane.f32.xlu0 %v1574_v27  ;;  %1362 = vmax.xlane.f32.xlu1 %v3421_v19 }
 0x2a0   : > { %v2979_v55 = vpop.eup %2176  ;;  %v3422_v57 = vmax.f32 %v2881_v47, %v2883_v31 }
 0x2a1   : > { %2186 = vpow2.f32 %v1468_v41  ;;  %v1472_v56 = vmul.f32 1.442695, %v1386_v17  ;;  %v1474_v33 = vmul.f32 1.442695, %v1387_v45  ;;  %v1577_v21 = vadd.f32 %v2979_v55, %v2972_v60 }
 0x2a2   : > { %2188 = vpow2.f32 %v1470_v46 }
 0x2a3   : > { %v2983_v49 = vpop.eup %2178  ;;  %2190 = vpow2.f32 %v1472_v56  ;;  %1359 = vmax.xlane.f32.xlu0 %v3422_v57  ;;  %1578 = vadd.xlane.f32.xlu1 %v1577_v21 }
 0x2a4   : > { %v2988_v59 = vpop.eup %2180  ;;  %2192 = vpow2.f32 %v1474_v33  ;;  %v1306_v50 = vpop.xlane.xlu0 %1305 }
 0x2a5   : > { %v1388_v35 = vsub.f32 %v2773_v61, %v1306_v50  ;;  %v1389_v24 = vsub.f32 %v2775_v62, %v1306_v50  ;;  %v1580_v37 = vadd.f32 %v2988_v59, %v2983_v49 }
 0x2a6   : > { %v1309_v39 = vpop.xlane.xlu1 %1308 }
 0x2a7   : > { %v2994_v7 = vpop.eup %2182  ;;  %v1476_v52 = vmul.f32 1.442695, %v1388_v35  ;;  %v1478_v53 = vmul.f32 1.442695, %v1389_v24  ;;  %v1390_v27 = vsub.f32 %v2777_v63, %v1309_v39  ;;  %v1391_v54 = vsub.f32 %v2781_v2, %v1309_v39  ;;  %1581 = vadd.xlane.f32.xlu0 %v1580_v37 }
 0x2a8   : > { %v2998_v41 = vpop.eup %2184 }
 0x2a9   : > { %2194 = vpow2.f32 %v1476_v52  ;;  %v1480_v46 = vmul.f32 1.442695, %v1390_v27  ;;  %v1482_v61 = vmul.f32 1.442695, %v1391_v54  ;;  %v1583_v62 = vadd.f32 %v2998_v41, %v2994_v7 }
 0x2aa   : > { %2196 = vpow2.f32 %v1478_v53 }
 0x2ab   : > { %v3002_v17 = vpop.eup %2186  ;;  %2198 = vpow2.f32 %v1480_v46  ;;  %1584 = vadd.xlane.f32.xlu1 %v1583_v62 }
 0x2ac   : > { %v3004_v45 = vpop.eup %2188  ;;  %2200 = vpow2.f32 %v1482_v61  ;;  %v1312_v63 = vpop.xlane.xlu0 %1311 }
 0x2ad   : > { %v3006_v19 = vpop.eup %2190  ;;  %v1392_v2 = vsub.f32 %v2785_v4, %v1312_v63  ;;  %v1393_v56 = vsub.f32 %v2787_v5, %v1312_v63  ;;  %v1586_v33 = vadd.f32 %v3004_v45, %v3002_v17 }
 0x2ae   : > { %v3012_v21 = vpop.eup %2192  ;;  %v1315_v57 = vpop.xlane.xlu1 %1314 }
 0x2af   : > { %v1484_v50 = vmul.f32 1.442695, %v1392_v2  ;;  %v1486_v35 = vmul.f32 1.442695, %v1393_v56  ;;  %v1394_v24 = vsub.f32 %v2789_v6, %v1315_v57  ;;  %v1395_v37 = vsub.f32 %v2793_v8, %v1315_v57  ;;  %1587 = vadd.xlane.f32.xlu0 %v1586_v33 }
 0x2b0   : > { %v1589_v39 = vadd.f32 %v3012_v21, %v3006_v19 }
 0x2b1   : > { %2202 = vpow2.f32 %v1484_v50  ;;  %v1488_v4 = vmul.f32 1.442695, %v1394_v24  ;;  %v1490_v52 = vmul.f32 1.442695, %v1395_v37 }
 0x2b2   : > { %2204 = vpow2.f32 %v1486_v35  ;;  %1590 = vadd.xlane.f32.xlu1 %v1589_v39 }
 0x2b3   : > { %v3018_v5 = vpop.eup %2194  ;;  %2206 = vpow2.f32 %v1488_v4 }
 0x2b4   : > { %v3020_v53 = vpop.eup %2196  ;;  %2208 = vpow2.f32 %v1490_v52  ;;  %v1318_v27 = vpop.xlane.xlu0 %1317 }
 0x2b5   : > { %v3022_v54 = vpop.eup %2198  ;;  %v1396_v6 = vsub.f32 %v2797_v20, %v1318_v27  ;;  %v1397_v8 = vsub.f32 %v2799_v22, %v1318_v27  ;;  %v1592_v46 = vadd.f32 %v3020_v53, %v3018_v5 }
 0x2b6   : > { %v3028_v61 = vpop.eup %2200  ;;  %v1321_v62 = vpop.xlane.xlu1 %1320 }
 0x2b7   : > { %v1492_v63 = vmul.f32 1.442695, %v1396_v6  ;;  %v1494_v2 = vmul.f32 1.442695, %v1397_v8  ;;  %v1398_v56 = vsub.f32 %v2801_v25, %v1321_v62  ;;  %v1399_v33 = vsub.f32 %v2805_v32, %v1321_v62  ;;  %1593 = vadd.xlane.f32.xlu0 %v1592_v46  ;;  %v3424_v32 = vld [vmem:[#allocation24_spill] sm:$0xff]  ;;  %v3425_v46 = vld [vmem:[#allocation25_spill] sm:$0xff] }
 0x2b8   : > { %v1595_v57 = vadd.f32 %v3028_v61, %v3022_v54 }
 0x2b9   : > { %2210 = vpow2.f32 %v1492_v63  ;;  %v1496_v20 = vmul.f32 1.442695, %v1398_v56  ;;  %v1498_v50 = vmul.f32 1.442695, %v1399_v33  ;;  %v3426_v63 = vld [vmem:[#allocation26_spill] sm:$0xff] }
 0x2ba   : > { %2212 = vpow2.f32 %v1494_v2  ;;  %1596 = vadd.xlane.f32.xlu1 %v1595_v57 }
 0x2bb   : > { %v3034_v22 = vpop.eup %2202  ;;  %2214 = vpow2.f32 %v1496_v20 }
 0x2bc   : > { %3423 = vst [vmem:[#allocation37_spill] sm:$0xff] %v3034_v22  ;;  %v3036_v35 = vpop.eup %2204  ;;  %2216 = vpow2.f32 %v1498_v50  ;;  %v1324_v24 = vpop.xlane.xlu0 %1323 }
 0x2bd   : > { %v3038_v37 = vpop.eup %2206  ;;  %v1400_v25 = vsub.f32 %v2809_v40, %v1324_v24  ;;  %v1401_v39 = vsub.f32 %v3424_v32, %v1324_v24  ;;  %v1598_v4 = vadd.f32 %v3036_v35, %v3034_v22 }
 0x2be   : > { %v3044_v52 = vpop.eup %2208  ;;  %v1327_v27 = vpop.xlane.xlu1 %1326 }
 0x2bf   : > { %v1500_v6 = vmul.f32 1.442695, %v1400_v25  ;;  %v1502_v8 = vmul.f32 1.442695, %v1401_v39  ;;  %v1402_v62 = vsub.f32 %v3425_v46, %v1327_v27  ;;  %v1403_v2 = vsub.f32 %v3426_v63, %v1327_v27  ;;  %1599 = vadd.xlane.f32.xlu0 %v1598_v4  ;;  %v3430_v25 = vld [vmem:[#allocation27_spill] sm:$0xff]  ;;  %v3431_v39 = vld [vmem:[#allocation28_spill] sm:$0xff] }
 0x2c0   : > { %v1601_v56 = vadd.f32 %v3044_v52, %v3038_v37  ;;  %v3433_v63 = vld [vmem:[#allocation29_spill] sm:$0xff] }
 0x2c1   : > { %2218 = vpow2.f32 %v1500_v6  ;;  %v1504_v40 = vmul.f32 1.442695, %v1402_v62  ;;  %v1506_v33 = vmul.f32 1.442695, %v1403_v2 }
 0x2c2   : > { %2220 = vpow2.f32 %v1502_v8  ;;  %1602 = vadd.xlane.f32.xlu1 %v1601_v56  ;;  %v3434_v56 = vld [vmem:[#allocation30_spill] sm:$0xff] }
 0x2c3   : > { %v3050_v57 = vpop.eup %2210  ;;  %2222 = vpow2.f32 %v1504_v40 }
 0x2c4   : > { %3427 = vst [vmem:[#allocation24_spill] sm:$0xff] %v3050_v57  ;;  %v3052_v20 = vpop.eup %2212  ;;  %2224 = vpow2.f32 %v1506_v33  ;;  %v1330_v50 = vpop.xlane.xlu0 %1329 }
 0x2c5   : > { %3428 = vst [vmem:[#allocation25_spill] sm:$0xff] %v3052_v20  ;;  %v3054_v24 = vpop.eup %2214  ;;  %v1404_v32 = vsub.f32 %v3430_v25, %v1330_v50  ;;  %v1405_v4 = vsub.f32 %v3431_v39, %v1330_v50  ;;  %v1604_v27 = vadd.f32 %v3052_v20, %v3050_v57  ;;  %v3437_v57 = vld [vmem:[#allocation33_spill] sm:$0xff] }
 0x2c6   : > { %3429 = vst [vmem:[#allocation26_spill] sm:$0xff] %v3054_v24  ;;  %v3060_v6 = vpop.eup %2216  ;;  %v1333_v8 = vpop.xlane.xlu1 %1332 }
 0x2c7   : > { %3432 = vst [vmem:[#allocation27_spill] sm:$0xff] %v3060_v6  ;;  %v1508_v46 = vmul.f32 1.442695, %v1404_v32  ;;  %v1510_v62 = vmul.f32 1.442695, %v1405_v4  ;;  %v1406_v2 = vsub.f32 %v3433_v63, %v1333_v8  ;;  %v1407_v40 = vsub.f32 %v3434_v56, %v1333_v8  ;;  %1605 = vadd.xlane.f32.xlu0 %v1604_v27  ;;  %v3435_v63 = vld [vmem:[#allocation31_spill] sm:$0xff] }
 0x2c8   : > { %v1607_v33 = vadd.f32 %v3060_v6, %v3054_v24  ;;  %v3436_v27 = vld [vmem:[#allocation32_spill] sm:$0xff]  ;;  %v3438_v24 = vld [vmem:[#allocation34_spill] sm:$0xff] }
 0x2c9   : > { %2226 = vpow2.f32 %v1508_v46  ;;  %v1512_v25 = vmul.f32 1.442695, %v1406_v2  ;;  %v1514_v22 = vmul.f32 1.442695, %v1407_v40 }
 0x2ca   : > { %2228 = vpow2.f32 %v1510_v62  ;;  %1608 = vadd.xlane.f32.xlu1 %v1607_v33 }
 0x2cb   : > { %v3066_v50 = vpop.eup %2218  ;;  %2230 = vpow2.f32 %v1512_v25 }
 0x2cc   : > { %v3068_v39 = vpop.eup %2220  ;;  %2232 = vpow2.f32 %v1514_v22  ;;  %v1336_v32 = vpop.xlane.xlu0 %1335 }
 0x2cd   : > { %v3070_v4 = vpop.eup %2222  ;;  %v1408_v8 = vsub.f32 %v3435_v63, %v1336_v32  ;;  %v1409_v56 = vsub.f32 %v3436_v27, %v1336_v32  ;;  %v1610_v46 = vadd.f32 %v3068_v39, %v3066_v50 }
 0x2ce   : > { %v3076_v2 = vpop.eup %2224  ;;  %v1339_v62 = vpop.xlane.xlu1 %1338 }
 0x2cf   : > { %v1516_v40 = vmul.f32 1.442695, %v1408_v8  ;;  %v1518_v33 = vmul.f32 1.442695, %v1409_v56  ;;  %v1410_v25 = vsub.f32 %v3437_v57, %v1339_v62  ;;  %v1411_v6 = vsub.f32 %v3438_v24, %v1339_v62  ;;  %1611 = vadd.xlane.f32.xlu0 %v1610_v46  ;;  %v3442_v46 = vld [vmem:[#allocation35_spill] sm:$0xff] }
 0x2d0   : > { %v1613_v22 = vadd.f32 %v3076_v2, %v3070_v4 }
 0x2d1   : > { %2234 = vpow2.f32 %v1516_v40  ;;  %v1520_v63 = vmul.f32 1.442695, %v1410_v25  ;;  %v1522_v20 = vmul.f32 1.442695, %v1411_v6  ;;  %v3443_v40 = vld [vmem:[#allocation36_spill] sm:$0xff] }
 0x2d2   : > { %2236 = vpow2.f32 %v1518_v33  ;;  %1614 = vadd.xlane.f32.xlu1 %v1613_v22 }
 0x2d3   : > { %v3082_v32 = vpop.eup %2226  ;;  %2238 = vpow2.f32 %v1520_v63 }
 0x2d4   : > { %3439 = vst [vmem:[#allocation28_spill] sm:$0xff] %v3082_v32  ;;  %v3084_v27 = vpop.eup %2228  ;;  %2240 = vpow2.f32 %v1522_v20 }
 0x2d5   : > { %3440 = vst [vmem:[#allocation29_spill] sm:$0xff] %v3084_v27  ;;  %v3086_v8 = vpop.eup %2230  ;;  %v1616_v57 = vadd.f32 %v3084_v27, %v3082_v32 }
 0x2d6   : > { %3441 = vst [vmem:[#allocation30_spill] sm:$0xff] %v3086_v8  ;;  %v3090_v24 = vpop.eup %2232  ;;  %v1345_v56 = vpop.xlane.xlu1 %1344 }
 0x2d7   : > { %v1414_v62 = vsub.f32 %v3442_v46, %v1345_v56  ;;  %v1415_v6 = vsub.f32 %v3443_v40, %v1345_v56  ;;  %1617 = vadd.xlane.f32.xlu0 %v1616_v57  ;;  %v1619_v33 = vadd.f32 %v3090_v24, %v3086_v8 }
 0x2d9   : > { %v1528_v25 = vmul.f32 1.442695, %v1414_v62  ;;  %v1530_v22 = vmul.f32 1.442695, %v1415_v6  ;;  %1620 = vadd.xlane.f32.xlu1 %v1619_v33 }
 0x2db   : > { %v3096_v20 = vpop.eup %2234  ;;  %2242 = vpow2.f32 %v1528_v25 }
 0x2dc   : > { %3444 = vst [vmem:[#allocation31_spill] sm:$0xff] %v3096_v20  ;;  %v3098_v63 = vpop.eup %2236  ;;  %2244 = vpow2.f32 %v1530_v22 }
 0x2dd   : > { %3445 = vst [vmem:[#allocation32_spill] sm:$0xff] %v3098_v63  ;;  %v3100_v32 = vpop.eup %2238  ;;  %v1622_v46 = vadd.f32 %v3098_v63, %v3096_v20 }
 0x2de   : > { %3446 = vst [vmem:[#allocation33_spill] sm:$0xff] %v3100_v32  ;;  %v3104_v27 = vpop.eup %2240 }
 0x2df   : > { %3447 = vst [vmem:[#allocation34_spill] sm:$0xff] %v3104_v27  ;;  %1623 = vadd.xlane.f32.xlu0 %v1622_v46  ;;  %v1625_v57 = vadd.f32 %v3104_v27, %v3100_v32 }
 0x2e1   : > { %1626 = vadd.xlane.f32.xlu1 %v1625_v57 }
 0x2e5   : > { %v3108_v56 = vpop.eup %2242 }
 0x2e6   : > { %3448 = vst [vmem:[#allocation35_spill] sm:$0xff] %v3108_v56  ;;  %v3110_v62 = vpop.eup %2244 }
 0x2e7   : > { %3449 = vst [vmem:[#allocation36_spill] sm:$0xff] %v3110_v62  ;;  %v1631_v40 = vadd.f32 %v3110_v62, %v3108_v56 }
 0x2e9   : > { %1632 = vadd.xlane.f32.xlu1 %v1631_v40 }
 0x314   : > { %v1558_v6 = vpop.xlane.xlu0 %1557 }
 0x315   : > { %2246 = vrcp.f32 %v1558_v6 }
 0x316   : > { %v1561_v33 = vpop.xlane.xlu1 %1560 }
 0x317   : > { %2248 = vrcp.f32 %v1561_v33 }
 0x318   : > { %v1342_v25 = vpop.xlane.xlu0 %1341 }
 0x319   : > { %v1412_v22 = vsub.f32 %v2845_v9, %v1342_v25  ;;  %v1413_v46 = vsub.f32 %v2847_v38, %v1342_v25 }
 0x31a   : > { %v1351_v20 = vpop.xlane.xlu1 %1350 }
 0x31b   : > { %v1524_v32 = vmul.f32 1.442695, %v1412_v22  ;;  %v1526_v57 = vmul.f32 1.442695, %v1413_v46  ;;  %v1418_v27 = vsub.f32 %v2861_v42, %v1351_v20  ;;  %v1419_v63 = vsub.f32 %v2865_v16, %v1351_v20 }
 0x31c   : > { %v1564_v8 = vpop.xlane.xlu0 %1563 }
 0x31d   : > { %2250 = vpow2.f32 %v1524_v32  ;;  %v1536_v56 = vmul.f32 1.442695, %v1418_v27  ;;  %v1538_v40 = vmul.f32 1.442695, %v1419_v63 }
 0x31e   : > { %2252 = vpow2.f32 %v1526_v57 }
 0x31f   : > { %v2247_v6 = vpop.eup %2246  ;;  %2254 = vpow2.f32 %v1536_v56 }
 0x320   : > { %2256 = vpow2.f32 %v1538_v40  ;;  %v1348_v33 = vpop.xlane.xlu0 %1347  ;;  %v1567_v62 = vpop.xlane.xlu1 %1566  ;;  %v1685_v42 = vmul.f32 %v2247_v6, %v2903_v58  ;;  %v1684_v32 = vmul.f32 %v2247_v6, %v2901_v12 }
 0x321   : > { %v2249_v9 = vpop.eup %2248  ;;  %2258 = vrcp.f32 %v1564_v8  ;;  %v1416_v38 = vsub.f32 %v2857_v44, %v1348_v33  ;;  %v1417_v25 = vsub.f32 %v2859_v14, %v1348_v33 }
 0x322   : > { %2260 = vrcp.f32 %v1567_v62  ;;  %v1687_v16 = vmul.f32 %v2249_v9, %v2911_v48  ;;  %v1686_v27 = vmul.f32 %v2249_v9, %v2905_v3 }
 0x323   : > { %v1532_v20 = vmul.f32 1.442695, %v1416_v38  ;;  %v1534_v63 = vmul.f32 1.442695, %v1417_v25 }
 0x324   : > { %v1570_v56 = vpop.xlane.xlu0 %1569  ;;  %v1357_v22 = vpop.xlane.xlu1 %1356  ;;  %v1753_v46 = vpack.c.bf16 %v1687_v16, %v1685_v42  ;;  %v1752_v57 = vpack.c.bf16 %v1686_v27, %v1684_v32 }
 0x325   : > { %2262 = vpow2.f32 %v1532_v20  ;;  %v1422_v44 = vsub.f32 %v2873_v10, %v1357_v22  ;;  %v1423_v14 = vsub.f32 %v2877_v13, %v1357_v22 }
 0x326   : > { %2264 = vpow2.f32 %v1534_v63  ;;  %1784 = vmatprep.subr.bf16.mxu1 %v1753_v46 }
 0x327   : > { %v3126_v58 = vpop.eup %2250  ;;  %v1544_v48 = vmul.f32 1.442695, %v1422_v44  ;;  %v1546_v8 = vmul.f32 1.442695, %v1423_v14  ;;  %1785 = vmatpush1.bf16.xpose.msra.mxu1 %v1752_v57  ;;  %2266 = vrcp.f32 %v1570_v56 }
 0x328   : > { %v3128_v12 = vpop.eup %2252  ;;  %v1354_v3 = vpop.xlane.xlu0 %1353 }
 0x329   : > { %v1573_v62 = vpop.xlane.xlu1 %1572  ;;  %v3130_v40 = vpop.eup %2254  ;;  %2268 = vpow2.f32 %v1544_v48  ;;  %v1420_v6 = vsub.f32 %v2869_v15, %v1354_v3  ;;  %v1421_v10 = vsub.f32 %v2871_v11, %v1354_v3  ;;  %v1628_v13 = vadd.f32 %v3128_v12, %v3126_v58 }
 0x32a   : > { %v3136_v33 = vpop.eup %2256  ;;  %2270 = vpow2.f32 %v1546_v8 }
 0x32b   : > { %v2259_v9 = vpop.eup %2258  ;;  %v1540_v38 = vmul.f32 1.442695, %v1420_v6  ;;  %v1542_v25 = vmul.f32 1.442695, %v1421_v10  ;;  %2272 = vrcp.f32 %v1573_v62  ;;  %1629 = vadd.xlane.f32.xlu0 %v1628_v13  ;;  %v1637_v42 = vadd.f32 %v3136_v33, %v3130_v40 }
 0x32c   : > { %v2261_v16 = vpop.eup %2260  ;;  %v1576_v32 = vpop.xlane.xlu0 %1575  ;;  %v1689_v11 = vmul.f32 %v2259_v9, %v2922_v29  ;;  %v1688_v20 = vmul.f32 %v2259_v9, %v2917_v30 }
 0x32d   : > { %v3140_v27 = vpop.xlane.xlu1 %1362  ;;  %2274 = vpow2.f32 %v1540_v38  ;;  %1638 = vadd.xlane.f32.xlu1 %v1637_v42  ;;  %v1691_v15 = vmul.f32 %v2261_v16, %v2933_v0  ;;  %v1690_v63 = vmul.f32 %v2261_v16, %v2931_v1 }
 0x32e   : > { %2276 = vpow2.f32 %v1542_v25 }
 0x32f   : > { %v3146_v56 = vpop.eup %2262  ;;  %v1755_v22 = vpack.c.bf16 %v1691_v15, %v1689_v11  ;;  %2278 = vrcp.f32 %v1576_v32  ;;  %v1754_v14 = vpack.c.bf16 %v1690_v63, %v1688_v20 }
 0x330   : > { %v3148_v46 = vpop.eup %2264  ;;  %v1360_v57 = vpop.xlane.xlu0 %1359 }
 0x331   : > { %v1579_v44 = vpop.xlane.xlu1 %1578  ;;  %1786 = vmatprep.subr.bf16.mxu1 %v1755_v22  ;;  %v1424_v48 = vsub.f32 %v2881_v47, %v1360_v57  ;;  %v1425_v29 = vsub.f32 %v2883_v31, %v1360_v57  ;;  %v1634_v0 = vadd.f32 %v3148_v46, %v3146_v56  ;;  %v2267_v30 = vpop.eup %2266 }
 0x332   : > { %1787 = vmatpush1.bf16.xpose.msra.mxu1 %v1754_v14  ;;  %2280 = vrcp.f32 %v1579_v44  ;;  %v1693_v31 = vmul.f32 %v2267_v30, %v2944_v28  ;;  %v1692_v9 = vmul.f32 %v2267_v30, %v2939_v51 }
 0x333   : > { %v3154_v1 = vpop.eup %2268  ;;  %v1548_v8 = vmul.f32 1.442695, %v1424_v48  ;;  %v1550_v3 = vmul.f32 1.442695, %v1425_v29  ;;  %1635 = vadd.xlane.f32.xlu0 %v1634_v0 }
 0x334   : > { %v3156_v62 = vpop.eup %2270  ;;  %v1582_v6 = vpop.xlane.xlu0 %1581 }
 0x335   : > { %v2273_v10 = vpop.eup %2272  ;;  %2282 = vpow2.f32 %v1548_v8  ;;  %v1643_v47 = vadd.f32 %v3156_v62, %v3154_v1 }
 0x336   : > { %2284 = vpow2.f32 %v1550_v3  ;;  %v1695_v13 = vmul.f32 %v2273_v10, %v2955_v34  ;;  %v1694_v38 = vmul.f32 %v2273_v10, %v2950_v18  ;;  %v425_v3 = vld [vmem:[%s3352_s9 + $0x8] sm:$0xff] }
 0x337   : > { %v3164_v25 = vpop.eup %2274  ;;  %2286 = vrcp.f32 %v1582_v6  ;;  %1644 = vadd.xlane.f32.xlu1 %v1643_v47 }
 0x338   : > { %v3166_v42 = vpop.eup %2276  ;;  %v1757_v16 = vpack.c.bf16 %v1695_v13, %v1693_v31  ;;  %v1585_v32 = vpop.xlane.xlu1 %1584  ;;  %v1756_v11 = vpack.c.bf16 %v1694_v38, %v1692_v9 }
 0x339   : > { %2288 = vrcp.f32 %v1585_v32  ;;  %v1640_v28 = vadd.f32 %v3166_v42, %v3164_v25  ;;  %v2279_v15 = vpop.eup %2278 }
 0x33a   : > { %1788 = vmatprep.subr.bf16.mxu1 %v1757_v16  ;;  %v1697_v18 = vmul.f32 %v2279_v15, %v2966_v26  ;;  %v1696_v63 = vmul.f32 %v2279_v15, %v2961_v23 }
 0x33b   : > { %1789 = vmatpush1.bf16.xpose.msra.mxu1 %v1756_v11  ;;  %1641 = vadd.xlane.f32.xlu0 %v1640_v28 }
 0x33c   : > { %v1588_v51 = vpop.xlane.xlu0 %1587  ;;  %v2281_v34 = vpop.eup %2280 }
 0x33d   : > { %2290 = vrcp.f32 %v1588_v51  ;;  %v1699_v20 = vmul.f32 %v2281_v34, %v2979_v55  ;;  %v1698_v22 = vmul.f32 %v2281_v34, %v2972_v60 }
 0x33f   : > { %v3174_v57 = vpop.eup %2282  ;;  %v1591_v44 = vpop.xlane.xlu1 %1590  ;;  %v1759_v48 = vpack.c.bf16 %v1699_v20, %v1697_v18  ;;  %v1758_v29 = vpack.c.bf16 %v1698_v22, %v1696_v63 }
 0x340   : > { %v3176_v14 = vpop.eup %2284  ;;  %2292 = vrcp.f32 %v1591_v44 }
 0x341   : > { %v2287_v0 = vpop.eup %2286  ;;  %v1646_v30 = vadd.f32 %v3176_v14, %v3174_v57  ;;  %1790 = vmatprep.subr.bf16.mxu1 %v1759_v48 }
 0x342   : > { %v1701_v23 = vmul.f32 %v2287_v0, %v2988_v59  ;;  %v1700_v6 = vmul.f32 %v2287_v0, %v2983_v49 }
 0x343   : > { %v2289_v26 = vpop.eup %2288  ;;  %1791 = vmatpush1.bf16.xpose.msra.mxu1 %v1758_v29  ;;  %1647 = vadd.xlane.f32.xlu0 %v1646_v30  ;;  %v419_v30 = vld [vmem:[%s3346_s3 + $0x8] sm:$0xff] }
 0x344   : > { %v1594_v55 = vpop.xlane.xlu0 %1593  ;;  %v1703_v60 = vmul.f32 %v2289_v26, %v2998_v41  ;;  %v1702_v8 = vmul.f32 %v2289_v26, %v2994_v7 }
 0x345   : > { %2294 = vrcp.f32 %v1594_v55  ;;  %v3450_v55 = vld [vmem:[#allocation37_spill] sm:$0xff] }
 0x346   : > { %v1761_v10 = vpack.c.bf16 %v1703_v60, %v1701_v23  ;;  %v1760_v31 = vpack.c.bf16 %v1702_v8, %v1700_v6  ;;  %v421_v8 = vld [vmem:[%s3346_s3 + $0x18] sm:$0xff] }
 0x347   : > { %v1597_v47 = vpop.xlane.xlu1 %1596  ;;  %v2291_v13 = vpop.eup %2290  ;;  %v3452_v6 = vld [vmem:[#allocation27_spill] sm:$0xff] }
 0x348   : > { %2296 = vrcp.f32 %v1597_v47  ;;  %921 = vperm.xlu1 %2125, %v425_v3   ;;  %1792 = vmatprep.subr.bf16.mxu1 %v1761_v10  ;;  %v1705_v59 = vmul.f32 %v2291_v13, %v3004_v45  ;;  %v1704_v32 = vmul.f32 %v2291_v13, %v3002_v17  ;;  %v424_v17 = vld [vmem:[%s3352_s9] sm:$0xff]  ;;  %v3453_v13 = vld [vmem:[#allocation26_spill] sm:$0xff] }
 0x34a   : > { %v2293_v9 = vpop.eup %2292 }
 0x34b   : > { %1793 = vmatpush1.bf16.xpose.msra.mxu1 %v1760_v31  ;;  %v1707_v7 = vmul.f32 %v2293_v9, %v3012_v21  ;;  %v1706_v16 = vmul.f32 %v2293_v9, %v3006_v19  ;;  %v1426_v21 = vsub.f32 %v2885_v36, %v3140_v27  ;;  %v1427_v19 = vsub.f32 %v2889_v43, %v3140_v27  ;;  %v427_v43 = vld [vmem:[%s3352_s9 + $0x18] sm:$0xff] }
 0x34c   : > { %v1600_v41 = vpop.xlane.xlu0 %1599 }
 0x34d   : > { %v1763_v38 = vpack.c.bf16 %v1707_v7, %v1705_v59  ;;  %2298 = vrcp.f32 %v1600_v41  ;;  %v1762_v28 = vpack.c.bf16 %v1706_v16, %v1704_v32  ;;  %v1552_v22 = vmul.f32 1.442695, %v1426_v21 }
 0x34e   : > { %v1554_v36 = vmul.f32 1.442695, %v1427_v19 }
 0x34f   : > { %1794 = vmatprep.subr.bf16.mxu1 %v1763_v38  ;;  %v1603_v49 = vpop.xlane.xlu1 %1602  ;;  %v2295_v11 = vpop.eup %2294  ;;  %v3454_v38 = vld [vmem:[#allocation24_spill] sm:$0xff] }
 0x350   : > { %2300 = vrcp.f32 %v1603_v49  ;;  %v1709_v51 = vmul.f32 %v2295_v11, %v3020_v53  ;;  %v1708_v53 = vmul.f32 %v2295_v11, %v3018_v5 }
 0x352   : > { %v2297_v15 = vpop.eup %2296 }
 0x353   : > { %1795 = vmatpush1.bf16.xpose.msra.mxu1 %v1762_v28  ;;  %v1711_v45 = vmul.f32 %v2297_v15, %v3028_v61  ;;  %v1710_v20 = vmul.f32 %v2297_v15, %v3022_v54 }
 0x354   : > { %v1606_v34 = vpop.xlane.xlu0 %1605 }
 0x355   : > { %v1765_v18 = vpack.c.bf16 %v1711_v45, %v1709_v51  ;;  %2302 = vrcp.f32 %v1606_v34  ;;  %v1764_v44 = vpack.c.bf16 %v1710_v20, %v1708_v53  ;;  %v3455_v53 = vld [vmem:[#allocation29_spill] sm:$0xff] }
 0x357   : > { %1796 = vmatprep.subr.bf16.mxu1 %v1765_v18  ;;  %v1609_v63 = vpop.xlane.xlu1 %1608  ;;  %v2299_v61 = vpop.eup %2298 }
 0x358   : > { %2304 = vrcp.f32 %v1609_v63  ;;  %v1713_v54 = vmul.f32 %v2299_v61, %v3036_v35  ;;  %v1712_v23 = vmul.f32 %v2299_v61, %v3450_v55  ;;  %v418_v55 = vld [vmem:[%s3346_s3] sm:$0xff] }
 0x359   : > { %916 = vperm.xlu0 %2124, %v424_v17   ;;  %2306 = vpow2.f32 %v1552_v22  ;;  %v3456_v22 = vld [vmem:[#allocation30_spill] sm:$0xff] }
 0x35a   : > { %v2301_v48 = vpop.eup %2300  ;;  %2308 = vpow2.f32 %v1554_v36 }
 0x35b   : > { %1797 = vmatpush1.bf16.xpose.msra.mxu1 %v1764_v44  ;;  %v1715_v27 = vmul.f32 %v2301_v48, %v3044_v52  ;;  %v1714_v0 = vmul.f32 %v2301_v48, %v3038_v37  ;;  %v3451_v37 = vld [vmem:[#allocation25_spill] sm:$0xff]  ;;  %v3457_v48 = vld [vmem:[#allocation28_spill] sm:$0xff] }
 0x35c   : > { %v1612_v29 = vpop.xlane.xlu0 %1611 }
 0x35d   : > { %931 = vperm.xlu0 %2124, %v427_v43   ;;  %v1767_v5 = vpack.c.bf16 %v1715_v27, %v1713_v54  ;;  %2310 = vrcp.f32 %v1612_v29  ;;  %v1766_v35 = vpack.c.bf16 %v1714_v0, %v1712_v23  ;;  %v3458_v27 = vld [vmem:[#allocation32_spill] sm:$0xff]  ;;  %v3461_v23 = vld [vmem:[#allocation31_spill] sm:$0xff] }
 0x35f   : > { %1798 = vmatprep.subr.bf16.mxu1 %v1767_v5  ;;  %v1615_v26 = vpop.xlane.xlu1 %1614  ;;  %v2303_v60 = vpop.eup %2302  ;;  %v3459_v5 = vld [vmem:[#allocation34_spill] sm:$0xff] }
 0x360   : > { %2312 = vrcp.f32 %v1615_v26  ;;  %v1717_v3 = vmul.f32 %v2303_v60, %v3451_v37  ;;  %v1716_v16 = vmul.f32 %v2303_v60, %v3454_v38 }
 0x361   : > { %468 = vperm.xlu0 %2124, %v419_v30   ;;  %v3460_v30 = vld [vmem:[#allocation33_spill] sm:$0xff] }
 0x362   : > { %v2305_v52 = vpop.eup %2304 }
 0x363   : > { %1799 = vmatpush1.bf16.xpose.msra.mxu1 %v1766_v35  ;;  %v1719_v10 = vmul.f32 %v2305_v52, %v3452_v6  ;;  %v1718_v9 = vmul.f32 %v2305_v52, %v3453_v13  ;;  %v3218_v59 = vpop.eup %2306  ;;  %v420_v52 = vld [vmem:[%s3346_s3 + $0x10] sm:$0xff] }
 0x364   : > { %v1618_v47 = vpop.xlane.xlu0 %1617  ;;  %v3220_v41 = vpop.eup %2308 }
 0x365   : > { %478 = vperm.xlu0 %2124, %v421_v8   ;;  %2314 = vrcp.f32 %v1618_v47  ;;  %v1769_v31 = vpack.c.bf16 %v1719_v10, %v1717_v3  ;;  %v1768_v32 = vpack.c.bf16 %v1718_v9, %v1716_v16  ;;  %v1649_v28 = vadd.f32 %v3220_v41, %v3218_v59  ;;  %v3462_v9 = vld [vmem:[#allocation36_spill] sm:$0xff]  ;;  %v3463_v16 = vld [vmem:[#allocation35_spill] sm:$0xff] }
 0x366   : > { %v1621_v7 = vpop.xlane.xlu1 %1620 }
 0x367   : > { %1800 = vmatprep.subr.bf16.mxu1 %v1769_v31  ;;  %2316 = vrcp.f32 %v1621_v7  ;;  %v2311_v49 = vpop.eup %2310 }
 0x368   : > { %v1721_v15 = vmul.f32 %v2311_v49, %v3068_v39  ;;  %v1720_v20 = vmul.f32 %v2311_v49, %v3066_v50  ;;  %v426_v50 = vld [vmem:[%s3352_s9 + $0x10] sm:$0xff] }
 0x36a   : > { %v2313_v11 = vpop.eup %2312 }
 0x36b   : > { %1801 = vmatpush1.bf16.xpose.msra.mxu1 %v1768_v32  ;;  %v1723_v51 = vmul.f32 %v2313_v11, %v3076_v2  ;;  %v1722_v34 = vmul.f32 %v2313_v11, %v3070_v4 }
 0x36c   : > { %1650 = vadd.xlane.f32.xlu1 %v1649_v28  ;;  %v1624_v45 = vpop.xlane.xlu0 %1623 }
 0x36d   : > { %2318 = vrcp.f32 %v1624_v45  ;;  %v1771_v21 = vpack.c.bf16 %v1723_v51, %v1721_v15  ;;  %v1770_v63 = vpack.c.bf16 %v1722_v34, %v1720_v20 }
 0x36e   : > { %v1627_v19 = vpop.xlane.xlu1 %1626 }
 0x36f   : > { %v2315_v18 = vpop.eup %2314  ;;  %1802 = vmatprep.subr.bf16.mxu1 %v1771_v21  ;;  %2320 = vrcp.f32 %v1627_v19 }
 0x370   : > { %v1725_v61 = vmul.f32 %v2315_v18, %v3455_v53  ;;  %v1724_v4 = vmul.f32 %v2315_v18, %v3457_v48  ;;  %v3466_v48 = vld [vmem:[#allocation16_spill] sm:$0xff] }
 0x371   : > { %v2317_v17 = vpop.eup %2316 }
 0x372   : > { %v1727_v39 = vmul.f32 %v2317_v17, %v3090_v24  ;;  %v1726_v36 = vmul.f32 %v2317_v17, %v3456_v22 }
 0x373   : > { %1803 = vmatpush1.bf16.xpose.msra.mxu1 %v1770_v63 }
 0x374   : > { %v1773_v2 = vpack.c.bf16 %v1727_v39, %v1725_v61  ;;  %v1772_v54 = vpack.c.bf16 %v1726_v36, %v1724_v4  ;;  %v3465_v36 = vld [vmem:[#allocation19_spill] sm:$0xff] }
 0x376   : > { %1804 = vmatprep.subr.bf16.mxu1 %v1773_v2  ;;  %v1633_v8 = vpop.xlane.xlu1 %1632 }
 0x377   : > { %v2319_v44 = vpop.eup %2318  ;;  %2322 = vrcp.f32 %v1633_v8 }
 0x378   : > { %v1729_v29 = vmul.f32 %v2319_v44, %v3458_v27  ;;  %v1728_v60 = vmul.f32 %v2319_v44, %v3461_v23  ;;  %v3468_v27 = vld [vmem:[#allocation22_spill] sm:$0xff] }
 0x379   : > { %v2321_v43 = vpop.eup %2320 }
 0x37a   : > { %v1731_v0 = vmul.f32 %v2321_v43, %v3459_v5  ;;  %v1730_v26 = vmul.f32 %v2321_v43, %v3460_v30  ;;  %v3467_v43 = vld [vmem:[#allocation17_spill] sm:$0xff]  ;;  %v3469_v5 = vld [vmem:[#allocation23_spill] sm:$0xff] }
 0x37b   : > { %1805 = vmatpush1.bf16.xpose.msra.mxu1 %v1772_v54 }
 0x37c   : > { %v1775_v24 = vpack.c.bf16 %v1731_v0, %v1729_v29  ;;  %v1774_v35 = vpack.c.bf16 %v1730_v26, %v1728_v60  ;;  %v3471_v26 = vld [vmem:[#allocation21_spill] sm:$0xff] }
 0x37d   : > { %926 = vperm.xlu1 %2125, %v426_v50  }
 0x37e   : > { %1806 = vmatprep.subr.bf16.mxu1 %v1775_v24  ;;  %v3470_v24 = vld [vmem:[#allocation20_spill] sm:$0xff] }
 0x381   : > { %463 = vperm.xlu1 %2125, %v418_v55   ;;  %v2323_v10 = vpop.eup %2322 }
 0x382   : > { %v1735_v7 = vmul.f32 %v2323_v10, %v3462_v9  ;;  %v1734_v49 = vmul.f32 %v2323_v10, %v3463_v16 }
 0x383   : > { %1807 = vmatpush1.bf16.xpose.msra.mxu1 %v1774_v35 }
 0x385   : > { %473 = vperm.xlu1 %2125, %v420_v52  }
 0x3b8   : > { %v1630_v37 = vpop.xlane.xlu0 %1629 }
 0x3b9   : > { %2324 = vrcp.f32 %v1630_v37 }
 0x3ba   : > { %v1639_v3 = vpop.xlane.xlu1 %1638 }
 0x3bb   : > { %2326 = vrcp.f32 %v1639_v3 }
 0x3c0   : > { %v1636_v6 = vpop.xlane.xlu0 %1635 }
 0x3c1   : > { %2328 = vrcp.f32 %v1636_v6 }
 0x3c3   : > { %v2325_v47 = vpop.eup %2324 }
 0x3c4   : > { %v1645_v31 = vpop.xlane.xlu1 %1644  ;;  %v1733_v13 = vmul.f32 %v2325_v47, %v3128_v12  ;;  %v1732_v38 = vmul.f32 %v2325_v47, %v3126_v58 }
 0x3c5   : > { %2330 = vrcp.f32 %v1645_v31  ;;  %v2327_v15 = vpop.eup %2326 }
 0x3c6   : > { %v1777_v32 = vpack.c.bf16 %v1735_v7, %v1733_v13  ;;  %v1776_v11 = vpack.c.bf16 %v1734_v49, %v1732_v38  ;;  %v1739_v21 = vmul.f32 %v2327_v15, %v3136_v33  ;;  %v1738_v34 = vmul.f32 %v2327_v15, %v3130_v40  ;;  %v3464_v40 = vld [vmem:[#allocation18_spill] sm:$0xff] }
 0x3c7   : > { %v1837_v13 = vstv %s407_s13 }
 0x3c8   : > { %v1642_v28 = vpop.xlane.xlu0 %1641  ;;  %1808 = vmatprep.subr.bf16.mxu1 %v1777_v32  ;;  %v922_v33 = vpop.permute.xlu1 %921 }
 0x3c9   : > { %2332 = vrcp.f32 %v1642_v28  ;;  %1809 = vmatpush1.bf16.xpose.msra.mxu1 %v1776_v11  ;;  %v989_v22 = vadd.f32 %v3464_v40, %v922_v33  ;;  %v991_v44 = vadd.f32 %v3465_v36, %v922_v33  ;;  %v3474_v11 = vld [vmem:[#allocation10_spill] sm:$0xff] }
 0x3cb   : > { %v2329_v51 = vpop.eup %2328 }
 0x3cc   : > { %v1737_v45 = vmul.f32 %v2329_v51, %v3148_v46  ;;  %v1736_v12 = vmul.f32 %v2329_v51, %v3146_v56 }
 0x3ce   : > { %v1779_v58 = vpack.c.bf16 %v1739_v21, %v1737_v45  ;;  %v1778_v19 = vpack.c.bf16 %v1738_v34, %v1736_v12  ;;  %v3475_v21 = vld [vmem:[#allocation11_spill] sm:$0xff] }
 0x3cf   : > { %v2331_v18 = vpop.eup %2330 }
 0x3d0   : > { %1810 = vmatprep.subr.bf16.mxu1 %v1779_v58  ;;  %v1648_v17 = vpop.xlane.xlu0 %1647  ;;  %v1743_v53 = vmul.f32 %v2331_v18, %v3156_v62  ;;  %v1742_v46 = vmul.f32 %v2331_v18, %v3154_v1 }
 0x3d1   : > { %1811 = vmatpush1.bf16.xpose.msra.mxu1 %v1778_v19  ;;  %2334 = vrcp.f32 %v1648_v17 }
 0x3d3   : > { %v2333_v20 = vpop.eup %2332 }
 0x3d4   : > { %v1741_v63 = vmul.f32 %v2333_v20, %v3166_v42  ;;  %v1740_v61 = vmul.f32 %v2333_v20, %v3164_v25 }
 0x3d6   : > { %v1781_v39 = vpack.c.bf16 %v1743_v53, %v1741_v63  ;;  %v1780_v56 = vpack.c.bf16 %v1742_v46, %v1740_v61  ;;  %v3476_v53 = vld [vmem:[#allocation12_spill] sm:$0xff] }
 0x3d8   : > { %v917_v2 = vpop.permute.xlu0 %916  ;;  %1812 = vmatprep.subr.bf16.mxu1 %v1781_v39  ;;  %v3477_v39 = vld [vmem:[#allocation13_spill] sm:$0xff] }
 0x3d9   : > { %v985_v4 = vadd.f32 %v3466_v48, %v917_v2  ;;  %v987_v54 = vadd.f32 %v3467_v43, %v917_v2  ;;  %1813 = vmatpush1.bf16.xpose.msra.mxu1 %v1780_v56  ;;  %v3479_v43 = vld [vmem:[#allocation15_spill] sm:$0xff] }
 0x3db   : > { %v1748_v42 = vpack.c.bf16 %v989_v22, %v985_v4  ;;  %v1749_v62 = vpack.c.bf16 %v991_v44, %v987_v54  ;;  %v2335_v35 = vpop.eup %2334  ;;  %v3478_v22 = vld [vmem:[#allocation14_spill] sm:$0xff] }
 0x3dc   : > { %v932_v1 = vpop.permute.xlu0 %931  ;;  %v1745_v8 = vmul.f32 %v2335_v35, %v3176_v14  ;;  %v1744_v3 = vmul.f32 %v2335_v35, %v3174_v57 }
 0x3dd   : > { %1816 = vmatprep.mubr.bf16.mxu1 %v1749_v62  ;;  %v999_v29 = vadd.f32 %v3468_v27, %v932_v1  ;;  %v1001_v0 = vadd.f32 %v3469_v5, %v932_v1 }
 0x3e0   : > { %v469_v14 = vpop.permute.xlu0 %468 }
 0x3e1   : > { %v553_v28 = vadd.f32 %v3474_v11, %v469_v14  ;;  %v555_v12 = vadd.f32 %v3475_v21, %v469_v14 }
 0x3e4   : > { %v479_v17 = vpop.permute.xlu0 %478 }
 0x3e5   : > { %v563_v36 = vadd.f32 %v3478_v22, %v479_v17  ;;  %v565_v54 = vadd.f32 %v3479_v43, %v479_v17 }
 0x3f9   : > { %v1651_v25 = vpop.xlane.xlu1 %1650 }
 0x3fa   : > { %2336 = vrcp.f32 %v1651_v25 }
 0x3fd   : > { %v927_v50 = vpop.permute.xlu1 %926 }
 0x3fe   : > { %v995_v30 = vadd.f32 %v3470_v24, %v927_v50  ;;  %v997_v55 = vadd.f32 %v3471_v26, %v927_v50 }
 0x400   : > { %v1750_v23 = vpack.c.bf16 %v999_v29, %v995_v30  ;;  %v1751_v60 = vpack.c.bf16 %v1001_v0, %v997_v55 }
 0x401   : > { %v464_v31 = vpop.permute.xlu1 %463 }
 0x404   : > { %v2337_v52 = vpop.eup %2336 }
 0x405   : > { %v1747_v37 = vmul.f32 %v2337_v52, %v3220_v41  ;;  %v1746_v6 = vmul.f32 %v2337_v52, %v3218_v59  ;;  %v3472_v41 = vld [vmem:[#allocation8_spill] sm:$0xff]  ;;  %v3473_v59 = vld [vmem:[#allocation9_spill] sm:$0xff]  ;;  %v474_v18 = vpop.permute.xlu1 %473 }
 0x406   : > { %v549_v7 = vadd.f32 %v3472_v41, %v464_v31  ;;  %v551_v16 = vadd.f32 %v3473_v59, %v464_v31  ;;  %v559_v61 = vadd.f32 %v3476_v53, %v474_v18  ;;  %v561_v56 = vadd.f32 %v3477_v39, %v474_v18 }
 0x407   : > { %v1783_v10 = vpack.c.bf16 %v1747_v37, %v1745_v8  ;;  %v1782_v47 = vpack.c.bf16 %v1746_v6, %v1744_v3 }
 0x409   : > { %1814 = vmatprep.subr.bf16.mxu1 %v1783_v10 }
 0x40a   : > { %1815 = vmatpush1.bf16.xpose.msra.mxu1 %v1782_v47 }
 0x411   : > { %1817 = vmatmul.mubr.bf16.vlgmr.msra.gmra.mrb[40].mxu1 %v1748_v42 }
 0x412   : > { %1826 = vmatprep.mubr.bf16.mxu1 %v1751_v60 }
 0x419   : > { %1827 = vmatmul.mubr.bf16.gmra.mrb[44].mxu1 %v1750_v23 }
 0x4e4   : > { %v1818_v9 = vpop.f32.mrb[40].mxu1 }
 0x4e5   : > { %v1838_v57 = vmul.f32 %v1837_v13, %v1818_v9  ;;  %v1820_v38 = vpop.f32.mrb[41].mxu1 }
 0x4e6   : > { %v1839_v49 = vmul.f32 %v1837_v13, %v1820_v38  ;;  %v1822_v32 = vpop.f32.mrb[42].mxu1 }
 0x4e7   : > { %v1846_v15 = vadd.f32 %v1838_v57, %v549_v7  ;;  %v1840_v51 = vmul.f32 %v1837_v13, %v1822_v32  ;;  %v1824_v45 = vpop.f32.mrb[43].mxu1 }
 0x4e8   : > { %v1847_v34 = vadd.f32 %v1839_v49, %v551_v16  ;;  %v1841_v58 = vmul.f32 %v1837_v13, %v1824_v45 }
 0x4e9   : > { %1854 = vst [vmem:[%s3277_s27] sm:$0xff] %v1846_v15  ;;  %v1848_v19 = vadd.f32 %v1840_v51, %v553_v28 }
 0x4ea   : > { %1855 = vst [vmem:[%s3277_s27 + $0x8] sm:$0xff] %v1847_v34  ;;  %v1849_v20 = vadd.f32 %v1841_v58, %v555_v12 }
 0x4eb   : > { %1856 = vst [vmem:[%s3277_s27 + $0x10] sm:$0xff] %v1848_v19 }
 0x4ec   : > { %1857 = vst [vmem:[%s3277_s27 + $0x18] sm:$0xff] %v1849_v20  ;;  %v1828_v63 = vpop.f32.mrb[44].mxu1 }
 0x4ed   : > { %v1842_v46 = vmul.f32 %v1837_v13, %v1828_v63  ;;  %v1830_v33 = vpop.f32.mrb[45].mxu1 }
 0x4ee   : > { %v1843_v2 = vmul.f32 %v1837_v13, %v1830_v33  ;;  %v1832_v40 = vpop.f32.mrb[46].mxu1 }
 0x4ef   : > { %v1850_v44 = vadd.f32 %v1842_v46, %v559_v61  ;;  %v1844_v48 = vmul.f32 %v1837_v13, %v1832_v40  ;;  %v1834_v4 = vpop.f32.mrb[47].mxu1 }
 0x4f0   : > { %v1851_v42 = vadd.f32 %v1843_v2, %v561_v56  ;;  %v1845_v62 = vmul.f32 %v1837_v13, %v1834_v4 }
 0x4f1   : > { %1858 = vst [vmem:[%s3277_s27 + $0x20] sm:$0xff] %v1850_v44  ;;  %v1852_v25 = vadd.f32 %v1844_v48, %v563_v36 }
 0x4f2   : > { %1859 = vst [vmem:[%s3277_s27 + $0x28] sm:$0xff] %v1851_v42  ;;  %v1853_v1 = vadd.f32 %v1845_v62, %v565_v54 }
 0x4f3   : > { %1860 = vst [vmem:[%s3277_s27 + $0x30] sm:$0xff] %v1852_v25 }
 0x4f4   : > { %1861 = vst [vmem:[%s3277_s27 + $0x38] sm:$0xff] %v1853_v1 }
 0x4f5   : > { %2351 = shalt.err (!%p2348_p3)
}
 0x4f6   : > { %s2352_s13 = scalar_lea.hbm %s3293_s23, 1024  ;;  %s2356_s27 = scalar_lea.hbm %s3354_s11, 2048 }
 0x4f7   : > { %p2353_p4 = scmp.ne.s32.totalorder %s3293_s23, %s2352_s13  ;;  %p2357_p9 = scmp.lt.u32.totalorder %s3293_s23, %s3354_s11 }
 0x4f8   : > { %p2358_p10 = scmp.lt.u32.totalorder %s2356_s27, %s2352_s13  ;;  %p2360_p12 = scmp.lt.u32.totalorder %s2352_s13, %s3293_s23 }
 0x4f9   : > { %p2354_p7 = pnand %p2353_p4, %p2507_p5 }
 0x4fa   : > { %p2359_p11 = por %p2358_p10, %p2357_p9 }
 0x4fb   : > { %p2355_p8 = pneg %p2354_p7 }
 0x4fc   : > { %p2361_p13 = por %p2360_p12, %p2359_p11 }
 0x4fe   : > { %p2362_p0 = pnand %p2361_p13, %p2355_p8 }
 0x500   : > { %2365 = shalt.err (!%p2362_p0)
}
 0x501   : > { %s2404_s18 = smov 256   ;;  %s2405_s25 = smov 16  }
 0x502   : > { %2082 = dma.vmem_to_hbm [thread:$0]  (%p2507_p5), %s3295_s16, 1024, %s3293_s23, %s3302_s10, %s2404_s18, %s2404_s18, %s2405_s25  }
 0x503 PF: > { %p2088_p1 = scmp.ge.s32.totalorder %s2400_s22, 2  ;;  %s1891_s26 = sand.u32 1, %s2388_s19  }
 0x504   : > { %s1892_s30 = scalar_lea.sflag [#allocation4], %s1891_s26 }
 0x505   : > { %p2085_p2 = pnand %p2088_p1, %p2511_p6 }
 0x507   : > { %2383 = dma.done.wait (!%p2085_p2), %s1892_s30, 1024  }
 0x508   : > { %2385 = vsyncadd (!%p2085_p2), %s1892_s30, 4294966272  ;;  %s3480_s12 = sld [smem:[#allocation6_spill]]  ;;  %s3481_s21 = sld [smem:[#allocation7_spill]] }
 0x509   : > { %p22_p3 = scmp.ge.s32.totalorder %s2494_s24, 4   ;;  %s3482_s19 = smov %s2392_s20 }
 0x50a   : > { %s3484_s22 = smov %s2494_s24 }
 0x50b   :  { %24 = sbr.rel (!%p22_p3) target bundleno = 5 (0x5), region = 102 }
 0x50e   : > { %s3483_s20 = smov %s3480_s12 }
 0x512   :  { %1897 = vsyncpa [#allocation4], 1 }
 0x513   :  { %1899 = vsyncpa [#allocation4 + $0x1], 1 }

</bundles_post_ra>
